<compile_context>
chip_gen: v7x
topology: tpu7x:2x2x1
jax: 0.10.0
libtpu: 0.0.40
codegen_flags: <defaults>
</compile_context>

<pallas_src>
import math

import jax
import jax.numpy as jnp
from jax import lax
from jax.experimental import pallas as pl
from jax.experimental.pallas import tpu as pltpu

# ---- config (mirrors MotionTransformer.__init__) ----
IN_DIM = 16          # config.MODEL.IN_DIM
OUT_DIM = 8          # config.MODEL.OUT_DIM
FEATURE_DIM = 128    # EXPERT_HIDDEN_SIZE (divisible by 8 heads, lane-aligned)
QUERY_NUM = 8        # QUERY_NUM
NUM_HEADS = 8
HEAD_DIM = FEATURE_DIM // NUM_HEADS
LN_EPS = 1e-5        # torch.nn.LayerNorm default eps

IN_PAD = 128         # zero-pad IN_DIM so input_proj has a lane-aligned K
OUT_PAD = 128        # zero-pad OUT_DIM so the output store is lane-dense
MAX_TILE_B = 256     # batch rows folded into the matmul M dim per grid step

# Row indices inside the packed (24,128) bias/LN-vector slab.
(R_B_IN, R_B_A1, R_G11, R_B11, R_B_M1, R_G12, R_B12, R_B_BLK,
 R_GB1, R_BB1, R_B_BM, R_GB2, R_BB2, R_B_A2, R_G21, R_B21,
 R_B_M2, R_G22, R_B22, R_B_OUT) = range(20)


def _round_up(n, m):
    return ((n + m - 1) // m) * m


# ------------------------------- Pallas kernel -------------------------------
def _motion_transformer_kernel(
        x_ref,
        w_in, w_a1, m1w1, m1w2, w_blk, bkw1, bkw2, w_a2, m2w1, m2w2, w_out,
        v128, v512, o_ref):
    """Q-collapsed forward: every tensor is a (TILE_B, F) slab."""

    def vec(i):                         # (1, 128) f32 bias / gamma / beta row
        return v128[i:i + 1, :]

    def vec5(i):                        # (1, 512) f32 MLP hidden bias row
        return v512[i:i + 1, :]

    def lin(x, w_ref, b):               # bf16 MXU matmul, f32 accumulate + bias
        return jnp.dot(x.astype(jnp.bfloat16), w_ref[...],
                       preferred_element_type=jnp.float32) + b

    def ln(x, gi, bi):                  # torch LayerNorm (biased variance), f32
        mu = jnp.mean(x, axis=-1, keepdims=True)
        xc = x - mu
        var = jnp.mean(xc * xc, axis=-1, keepdims=True)
        # Padded batch rows are all-zero -> var == 0; LN_EPS > 0 keeps this finite.
        return xc * lax.rsqrt(var + LN_EPS) * vec(gi) + vec(bi)

    def elu(x):                         # ELU(alpha=1); clamp exp arg of dead branch
        return jnp.where(x > 0, x, jnp.exp(jnp.minimum(x, 0.0)) - 1.0)

    def mlp(x, w1, b1i, w2, b2i):       # Linear -> ELU -> Linear (Dropout == id)
        return lin(elu(lin(x, w1, vec5(b1i))), w2, vec(b2i))

    x = x_ref[...]                                             # (B, IN_PAD) f32
    h = lin(x, w_in, vec(R_B_IN))                              # input_proj -> (B, F)

    # attn1: kv length == 1 -> softmax == 1 -> out_proj(v_proj(h)), fused weight.
    a = lin(h, w_a1, vec(R_B_A1))
    a = ln(a, R_G11, R_B11)
    a = ln(a + mlp(a, m1w1, 0, m1w2, R_B_M1), R_G12, R_B12)

    # TransformerBlock: all Q tokens identical -> uniform softmax -> out_proj(v_proj).
    t = ln(a + lin(a, w_blk, vec(R_B_BLK)), R_GB1, R_BB1)
    t = ln(t + mlp(t, bkw1, 1, bkw2, R_B_BM), R_GB2, R_BB2)

    # attn2: one query over Q identical keys -> uniform softmax -> out_proj(v_proj).
    z = lin(t, w_a2, vec(R_B_A2))
    z = ln(z, R_G21, R_B21)
    z = ln(z + mlp(z, m2w1, 2, m2w2, R_B_M2), R_G22, R_B22)

    o_ref[...] = lin(z, w_out, vec(R_B_OUT))                   # (B, OUT_PAD) f32


# --------------------------- host-side param prep ----------------------------
def _prepare_params(params):
    """Build the kernel-side weight list and packed bias slabs.

    * attn1 / block-attn / attn2 v_proj∘out_proj fused into single (F,F) weights.
    * query1 / query2 / all q,k projections dropped (they cannot affect the
      output in eval mode, see kernel comments).
    * Matmul weights cast to bf16; biases / LN vectors kept f32 and packed into
      one (24,128) slab plus one (8,512) slab.
    * I/O projections zero-padded to lane width.
    """
    f = FEATURE_DIM

    def fuse_vo(a):
        # out_proj(v_proj(x)) == x @ (wv @ wo) + (bv @ wo + bo)
        w = jnp.dot(a["wv"], a["wo"], preferred_element_type=jnp.float32)
        b = jnp.dot(a["bv"], a["wo"], preferred_element_type=jnp.float32) + a["bo"]
        return w, b

    w_a1, b_a1 = fuse_vo(params["attn1"])
    w_blk, b_blk = fuse_vo(params["blk"]["attn"])
    w_a2, b_a2 = fuse_vo(params["attn2"])

    w_in = jnp.zeros((IN_PAD, f), jnp.float32).at[:IN_DIM].set(params["input_proj"]["w"])
    w_out = jnp.zeros((f, OUT_PAD), jnp.float32).at[:, :OUT_DIM].set(params["output_proj"]["w"])
    b_out = jnp.zeros((1, OUT_PAD), jnp.float32).at[:, :OUT_DIM].set(params["output_proj"]["b"])

    mats = [w_in, w_a1,
            params["mlp1"]["w1"], params["mlp1"]["w2"],
            w_blk,
            params["blk"]["mlp"]["w1"], params["blk"]["mlp"]["w2"],
            w_a2,
            params["mlp2"]["w1"], params["mlp2"]["w2"],
            w_out]
    mats = [m.astype(jnp.bfloat16) for m in mats]

    vec128_rows = [
        params["input_proj"]["b"], b_a1,
        params["ln1_1"]["g"], params["ln1_1"]["b"],
        params["mlp1"]["b2"],
        params["ln1_2"]["g"], params["ln1_2"]["b"],
        b_blk,
        params["blk"]["ln1"]["g"], params["blk"]["ln1"]["b"],
        params["blk"]["mlp"]["b2"],
        params["blk"]["ln2"]["g"], params["blk"]["ln2"]["b"],
        b_a2,
        params["ln2_1"]["g"], params["ln2_1"]["b"],
        params["mlp2"]["b2"],
        params["ln2_2"]["g"], params["ln2_2"]["b"],
        b_out,
    ]
    n = len(vec128_rows)
    vec128 = jnp.concatenate(
        vec128_rows + [jnp.zeros((_round_up(n, 8) - n, f), jnp.float32)], axis=0)

    vec512_rows = [params["mlp1"]["b1"], params["blk"]["mlp"]["b1"], params["mlp2"]["b1"]]
    m = len(vec512_rows)
    vec512 = jnp.concatenate(
        vec512_rows + [jnp.zeros((_round_up(m, 8) - m, 4 * f), jnp.float32)], axis=0)

    return mats, vec128.astype(jnp.float32), vec512.astype(jnp.float32)


def motion_transformer(x, params):
    """x: (bs, IN_DIM) float32 -> (bs, OUT_DIM) float32."""
    bs = x.shape[0]
    mats, vec128, vec512 = _prepare_params(params)

    # Tile so that any batch larger than one 8-row group yields >= 2 grid steps
    # (lets the "parallel" axis feed both TensorCores on v7x), capped at 256 rows.
    tile_b = min(MAX_TILE_B, max(8, _round_up(pl.cdiv(bs, 2), 8)))
    padded_bs = _round_up(bs, tile_b)
    xp = jnp.zeros((padded_bs, IN_PAD), jnp.float32).at[:bs, :IN_DIM].set(x)

    in_specs = [pl.BlockSpec((tile_b, IN_PAD), lambda b: (b, 0))]
    # Weights / packed vectors: full-array blocks with constant index maps (resident).
    in_specs += [pl.BlockSpec(m.shape, lambda b: (0, 0)) for m in mats]
    in_specs += [pl.BlockSpec(vec128.shape, lambda b: (0, 0)),
                 pl.BlockSpec(vec512.shape, lambda b: (0, 0))]
    out_spec = pl.BlockSpec((tile_b, OUT_PAD), lambda b: (b, 0))

    out = pl.pallas_call(
        _motion_transformer_kernel,
        out_shape=jax.ShapeDtypeStruct((padded_bs, OUT_PAD), jnp.float32),
        grid_spec=pltpu.PrefetchScalarGridSpec(
            num_scalar_prefetch=0,
            grid=(padded_bs // tile_b,),
            in_specs=in_specs,
            out_specs=out_spec,
        ),
        compiler_params=pltpu.CompilerParams(
            dimension_semantics=("parallel",),      # shards grid over 2 TCs on v7x
            vmem_limit_bytes=32 * 1024 * 1024,      # footprint is a few MB on all gens
        ),
    )(xp, *mats, vec128, vec512)
    return out[:bs, :OUT_DIM]


# ----------------------------- parameter init --------------------------------
def init_params(key):
    keys = iter(jax.random.split(key, 64))

    def w(shape, scale=0.05):
        return (scale * jax.random.normal(next(keys), shape)).astype(jnp.float32)

    def ln_p(f):
        return {"g": jnp.ones((1, f), jnp.float32), "b": jnp.zeros((1, f), jnp.float32)}

    def linear_p(din, dout):
        return {"w": w((din, dout)), "b": w((1, dout), 0.01)}

    def attn_p(f):
        return {"wq": w((f, f)), "wk": w((f, f)), "wv": w((f, f)),
                "bq": w((1, f), 0.01), "bk": w((1, f), 0.01), "bv": w((1, f), 0.01),
                "wo": w((f, f)), "bo": w((1, f), 0.01)}

    def mlp_p(f):
        return {"w1": w((f, 4 * f)), "b1": w((1, 4 * f), 0.01),
                "w2": w((4 * f, f)), "b2": w((1, f), 0.01)}

    f = FEATURE_DIM
    return {
        "input_proj": linear_p(IN_DIM, f),
        "query1": jax.random.normal(next(keys), (QUERY_NUM, f)).astype(jnp.float32),
        "attn1": attn_p(f),
        "ln1_1": ln_p(f),
        "mlp1": mlp_p(f),
        "ln1_2": ln_p(f),
        "blk": {"attn": attn_p(f), "ln1": ln_p(f), "mlp": mlp_p(f), "ln2": ln_p(f)},
        "attn2": attn_p(f),
        "query2": jax.random.normal(next(keys), (1, f)).astype(jnp.float32),
        "ln2_1": ln_p(f),
        "mlp2": mlp_p(f),
        "ln2_2": ln_p(f),
        "output_proj": linear_p(f, OUT_DIM),
    }


# ------------------------- pure-JAX reference (eval) --------------------------
def _linear(x, w, b):
    return jnp.dot(x, w, preferred_element_type=jnp.float32) + b


def _layernorm(x, g, b):
    mu = jnp.mean(x, axis=-1, keepdims=True)
    xc = x - mu
    var = jnp.mean(xc * xc, axis=-1, keepdims=True)
    return xc * lax.rsqrt(var + LN_EPS) * g + b


def _elu(x):
    return jnp.where(x > 0, x, jnp.exp(jnp.minimum(x, 0.0)) - 1.0)


def _mlp(x, p):
    return _linear(_elu(_linear(x, p["w1"], p["b1"])), p["w2"], p["b2"])


def _mha_ref(q_in, kv_in, p):
    """Full-fidelity torch.nn.MultiheadAttention mirror for one batch element."""
    q = _linear(q_in, p["wq"], p["bq"])
    k = _linear(kv_in, p["wk"], p["bk"])
    v = _linear(kv_in, p["wv"], p["bv"])
    scale = 1.0 / math.sqrt(HEAD_DIM)
    outs = []
    for h in range(NUM_HEADS):
        sl = slice(h * HEAD_DIM, (h + 1) * HEAD_DIM)
        qh = q[:, sl] * scale
        kh = k[:, sl]
        vh = v[:, sl]
        s = lax.dot_general(qh, kh, (((1,), (1,)), ((), ())),
                            preferred_element_type=jnp.float32)
        s = s - jnp.max(s, axis=-1, keepdims=True)
        e = jnp.exp(s)
        pr = e / jnp.sum(e, axis=-1, keepdims=True)
        outs.append(jnp.dot(pr, vh, preferred_element_type=jnp.float32))
    o = jnp.concatenate(outs, axis=-1)
    return _linear(o, p["wo"], p["bo"])


def _forward_single_ref(x_row, p):
    h = _linear(x_row, p["input_proj"]["w"], p["input_proj"]["b"])
    a = _mha_ref(p["query1"], h, p["attn1"])
    a = _layernorm(a, p["ln1_1"]["g"], p["ln1_1"]["b"])
    a = _layernorm(a + _mlp(a, p["mlp1"]), p["ln1_2"]["g"], p["ln1_2"]["b"])
    t = _layernorm(a + _mha_ref(a, a, p["blk"]["attn"]),
                   p["blk"]["ln1"]["g"], p["blk"]["ln1"]["b"])
    t = _layernorm(t + _mlp(t, p["blk"]["mlp"]),
                   p["blk"]["ln2"]["g"], p["blk"]["ln2"]["b"])
    z = _mha_ref(p["query2"], t, p["attn2"])
    z = _layernorm(z, p["ln2_1"]["g"], p["ln2_1"]["b"])
    z = _layernorm(z + _mlp(z, p["mlp2"]), p["ln2_2"]["g"], p["ln2_2"]["b"])
    return _linear(z, p["output_proj"]["w"], p["output_proj"]["b"])


def reference_forward(x, params):
    return jax.vmap(lambda xr: _forward_single_ref(xr[None, :], params)[0])(x)


# ----------------------------------- main -------------------------------------
if __name__ == "__main__":
    key = jax.random.PRNGKey(0)
    pkey, xkey = jax.random.split(key)
    params = init_params(pkey)

    bs = 2
    x = jax.random.normal(xkey, (bs, IN_DIM), dtype=jnp.float32)

    out = jax.jit(motion_transformer)(x, params)
    out = jax.block_until_ready(out)

    ref = reference_forward(x, params)
    assert out.shape == (bs, OUT_DIM)
    assert jnp.allclose(out, ref, atol=5e-2, rtol=5e-2), "Pallas output mismatch vs JAX reference"

    print("KERNEL_OK")
</pallas_src>

<mosaic_0001>
module attributes {stable_mosaic.version = 11 : i64} {
  func.func @_motion_transformer_kernel(%arg0: i32, %arg1: memref<8x128xf32, #tpu.memory_space<vmem>>, %arg2: memref<128x128xbf16, #tpu.memory_space<vmem>>, %arg3: memref<128x128xbf16, #tpu.memory_space<vmem>>, %arg4: memref<128x512xbf16, #tpu.memory_space<vmem>>, %arg5: memref<512x128xbf16, #tpu.memory_space<vmem>>, %arg6: memref<128x128xbf16, #tpu.memory_space<vmem>>, %arg7: memref<128x512xbf16, #tpu.memory_space<vmem>>, %arg8: memref<512x128xbf16, #tpu.memory_space<vmem>>, %arg9: memref<128x128xbf16, #tpu.memory_space<vmem>>, %arg10: memref<128x512xbf16, #tpu.memory_space<vmem>>, %arg11: memref<512x128xbf16, #tpu.memory_space<vmem>>, %arg12: memref<128x128xbf16, #tpu.memory_space<vmem>>, %arg13: memref<24x128xf32, #tpu.memory_space<vmem>>, %arg14: memref<8x512xf32, #tpu.memory_space<vmem>>, %arg15: memref<8x128xf32, #tpu.memory_space<vmem>>) attributes {dimension_semantics = [#tpu.dimension_semantics<parallel>], iteration_bounds = array<i64: 1>, scalar_prefetch = 0 : i64, scratch_operands = 0 : i64, tpu.core_type = #tpu.core_type<tc>, window_params = [{transform_indices = @transform_0, window_bounds = array<i64: 8, 128>}, {pipeline_mode = #tpu.pipeline_mode<synchronous>, transform_indices = @transform_1, window_bounds = array<i64: 128, 128>}, {pipeline_mode = #tpu.pipeline_mode<synchronous>, transform_indices = @transform_2, window_bounds = array<i64: 128, 128>}, {pipeline_mode = #tpu.pipeline_mode<synchronous>, transform_indices = @transform_3, window_bounds = array<i64: 128, 512>}, {pipeline_mode = #tpu.pipeline_mode<synchronous>, transform_indices = @transform_4, window_bounds = array<i64: 512, 128>}, {pipeline_mode = #tpu.pipeline_mode<synchronous>, transform_indices = @transform_5, window_bounds = array<i64: 128, 128>}, {pipeline_mode = #tpu.pipeline_mode<synchronous>, transform_indices = @transform_6, window_bounds = array<i64: 128, 512>}, {pipeline_mode = #tpu.pipeline_mode<synchronous>, transform_indices = @transform_7, window_bounds = array<i64: 512, 128>}, {pipeline_mode = #tpu.pipeline_mode<synchronous>, transform_indices = @transform_8, window_bounds = array<i64: 128, 128>}, {pipeline_mode = #tpu.pipeline_mode<synchronous>, transform_indices = @transform_9, window_bounds = array<i64: 128, 512>}, {pipeline_mode = #tpu.pipeline_mode<synchronous>, transform_indices = @transform_10, window_bounds = array<i64: 512, 128>}, {pipeline_mode = #tpu.pipeline_mode<synchronous>, transform_indices = @transform_11, window_bounds = array<i64: 128, 128>}, {pipeline_mode = #tpu.pipeline_mode<synchronous>, transform_indices = @transform_12, window_bounds = array<i64: 24, 128>}, {pipeline_mode = #tpu.pipeline_mode<synchronous>, transform_indices = @transform_13, window_bounds = array<i64: 8, 512>}, {transform_indices = @transform_14, window_bounds = array<i64: 8, 128>}]} {
    %c0 = arith.constant 0 : index
    %c0_0 = arith.constant 0 : index
    %0 = vector.load %arg1[%c0, %c0_0] : memref<8x128xf32, #tpu.memory_space<vmem>>, vector<8x128xf32>
    %c0_1 = arith.constant 0 : index
    %c0_2 = arith.constant 0 : index
    %1 = vector.load %arg13[%c0_1, %c0_2] : memref<24x128xf32, #tpu.memory_space<vmem>>, vector<1x128xf32>
    %2 = arith.truncf %0 : vector<8x128xf32> to vector<8x128xbf16>
    %c0_3 = arith.constant 0 : index
    %c0_4 = arith.constant 0 : index
    %3 = vector.load %arg2[%c0_3, %c0_4] : memref<128x128xbf16, #tpu.memory_space<vmem>>, vector<128x128xbf16>
    %cst = arith.constant dense<0.000000e+00> : vector<8x128xf32>
    %4 = tpu.matmul %2, %3, %cst {dimension_numbers = #tpu.dot_dimension_numbers<[1], [0], [0], [1], [0, 0, 1, 1], [], []>} : vector<8x128xbf16>, vector<128x128xbf16>, vector<8x128xf32> -> vector<8x128xf32>
    %5 = vector.broadcast %1 : vector<1x128xf32> to vector<8x128xf32>
    %6 = arith.addf %4, %5 : vector<8x128xf32>
    %c1 = arith.constant 1 : index
    %c0_5 = arith.constant 0 : index
    %7 = vector.load %arg13[%c1, %c0_5] : memref<24x128xf32, #tpu.memory_space<vmem>>, vector<1x128xf32>
    %8 = arith.truncf %6 : vector<8x128xf32> to vector<8x128xbf16>
    %c0_6 = arith.constant 0 : index
    %c0_7 = arith.constant 0 : index
    %9 = vector.load %arg3[%c0_6, %c0_7] : memref<128x128xbf16, #tpu.memory_space<vmem>>, vector<128x128xbf16>
    %cst_8 = arith.constant dense<0.000000e+00> : vector<8x128xf32>
    %10 = tpu.matmul %8, %9, %cst_8 {dimension_numbers = #tpu.dot_dimension_numbers<[1], [0], [0], [1], [0, 0, 1, 1], [], []>} : vector<8x128xbf16>, vector<128x128xbf16>, vector<8x128xf32> -> vector<8x128xf32>
    %11 = vector.broadcast %7 : vector<1x128xf32> to vector<8x128xf32>
    %12 = arith.addf %10, %11 : vector<8x128xf32>
    %cst_9 = arith.constant dense<0.000000e+00> : vector<8xf32>
    %13 = vector.multi_reduction <add>, %12, %cst_9 [1] : vector<8x128xf32> to vector<8xf32>
    %14 = vector.shape_cast %13 : vector<8xf32> to vector<8x1xf32>
    %cst_10 = arith.constant 1.280000e+02 : f32
    %15 = vector.broadcast %cst_10 : f32 to vector<8x1xf32>
    %16 = arith.divf %14, %15 : vector<8x1xf32>
    %17 = vector.broadcast %16 : vector<8x1xf32> to vector<8x128xf32>
    %18 = arith.subf %12, %17 : vector<8x128xf32>
    %19 = arith.mulf %18, %18 : vector<8x128xf32>
    %cst_11 = arith.constant dense<0.000000e+00> : vector<8xf32>
    %20 = vector.multi_reduction <add>, %19, %cst_11 [1] : vector<8x128xf32> to vector<8xf32>
    %21 = vector.shape_cast %20 : vector<8xf32> to vector<8x1xf32>
    %cst_12 = arith.constant 1.280000e+02 : f32
    %22 = vector.broadcast %cst_12 : f32 to vector<8x1xf32>
    %23 = arith.divf %21, %22 : vector<8x1xf32>
    %cst_13 = arith.constant 9.99999974E-6 : f32
    %24 = vector.broadcast %cst_13 : f32 to vector<8x1xf32>
    %25 = arith.addf %23, %24 : vector<8x1xf32>
    %26 = math.rsqrt %25 : vector<8x1xf32>
    %27 = vector.broadcast %26 : vector<8x1xf32> to vector<8x128xf32>
    %28 = arith.mulf %18, %27 : vector<8x128xf32>
    %c2 = arith.constant 2 : index
    %c0_14 = arith.constant 0 : index
    %29 = vector.load %arg13[%c2, %c0_14] : memref<24x128xf32, #tpu.memory_space<vmem>>, vector<1x128xf32>
    %30 = vector.broadcast %29 : vector<1x128xf32> to vector<8x128xf32>
    %31 = arith.mulf %28, %30 : vector<8x128xf32>
    %c3 = arith.constant 3 : index
    %c0_15 = arith.constant 0 : index
    %32 = vector.load %arg13[%c3, %c0_15] : memref<24x128xf32, #tpu.memory_space<vmem>>, vector<1x128xf32>
    %33 = vector.broadcast %32 : vector<1x128xf32> to vector<8x128xf32>
    %34 = arith.addf %31, %33 : vector<8x128xf32>
    %c0_16 = arith.constant 0 : index
    %c0_17 = arith.constant 0 : index
    %35 = vector.load %arg14[%c0_16, %c0_17] : memref<8x512xf32, #tpu.memory_space<vmem>>, vector<1x512xf32>
    %36 = arith.truncf %34 : vector<8x128xf32> to vector<8x128xbf16>
    %c0_18 = arith.constant 0 : index
    %c0_19 = arith.constant 0 : index
    %37 = vector.load %arg4[%c0_18, %c0_19] : memref<128x512xbf16, #tpu.memory_space<vmem>>, vector<128x512xbf16>
    %cst_20 = arith.constant dense<0.000000e+00> : vector<8x512xf32>
    %38 = tpu.matmul %36, %37, %cst_20 {dimension_numbers = #tpu.dot_dimension_numbers<[1], [0], [0], [1], [0, 0, 1, 1], [], []>} : vector<8x128xbf16>, vector<128x512xbf16>, vector<8x512xf32> -> vector<8x512xf32>
    %39 = vector.broadcast %35 : vector<1x512xf32> to vector<8x512xf32>
    %40 = arith.addf %38, %39 : vector<8x512xf32>
    %cst_21 = arith.constant 0.000000e+00 : f32
    %41 = vector.broadcast %cst_21 : f32 to vector<8x512xf32>
    %42 = arith.cmpf ogt, %40, %41 : vector<8x512xf32>
    %cst_22 = arith.constant 0.000000e+00 : f32
    %43 = vector.broadcast %cst_22 : f32 to vector<8x512xf32>
    %44 = arith.minimumf %40, %43 : vector<8x512xf32>
    %45 = math.exp %44 : vector<8x512xf32>
    %cst_23 = arith.constant 1.000000e+00 : f32
    %46 = vector.broadcast %cst_23 : f32 to vector<8x512xf32>
    %47 = arith.subf %45, %46 : vector<8x512xf32>
    %48 = arith.select %42, %40, %47 : vector<8x512xi1>, vector<8x512xf32>
    %c4 = arith.constant 4 : index
    %c0_24 = arith.constant 0 : index
    %49 = vector.load %arg13[%c4, %c0_24] : memref<24x128xf32, #tpu.memory_space<vmem>>, vector<1x128xf32>
    %50 = arith.truncf %48 : vector<8x512xf32> to vector<8x512xbf16>
    %c0_25 = arith.constant 0 : index
    %c0_26 = arith.constant 0 : index
    %51 = vector.load %arg5[%c0_25, %c0_26] : memref<512x128xbf16, #tpu.memory_space<vmem>>, vector<512x128xbf16>
    %cst_27 = arith.constant dense<0.000000e+00> : vector<8x128xf32>
    %52 = tpu.matmul %50, %51, %cst_27 {dimension_numbers = #tpu.dot_dimension_numbers<[1], [0], [0], [1], [0, 0, 1, 1], [], []>} : vector<8x512xbf16>, vector<512x128xbf16>, vector<8x128xf32> -> vector<8x128xf32>
    %53 = vector.broadcast %49 : vector<1x128xf32> to vector<8x128xf32>
    %54 = arith.addf %52, %53 : vector<8x128xf32>
    %55 = arith.addf %34, %54 : vector<8x128xf32>
    %cst_28 = arith.constant dense<0.000000e+00> : vector<8xf32>
    %56 = vector.multi_reduction <add>, %55, %cst_28 [1] : vector<8x128xf32> to vector<8xf32>
    %57 = vector.shape_cast %56 : vector<8xf32> to vector<8x1xf32>
    %cst_29 = arith.constant 1.280000e+02 : f32
    %58 = vector.broadcast %cst_29 : f32 to vector<8x1xf32>
    %59 = arith.divf %57, %58 : vector<8x1xf32>
    %60 = vector.broadcast %59 : vector<8x1xf32> to vector<8x128xf32>
    %61 = arith.subf %55, %60 : vector<8x128xf32>
    %62 = arith.mulf %61, %61 : vector<8x128xf32>
    %cst_30 = arith.constant dense<0.000000e+00> : vector<8xf32>
    %63 = vector.multi_reduction <add>, %62, %cst_30 [1] : vector<8x128xf32> to vector<8xf32>
    %64 = vector.shape_cast %63 : vector<8xf32> to vector<8x1xf32>
    %cst_31 = arith.constant 1.280000e+02 : f32
    %65 = vector.broadcast %cst_31 : f32 to vector<8x1xf32>
    %66 = arith.divf %64, %65 : vector<8x1xf32>
    %cst_32 = arith.constant 9.99999974E-6 : f32
    %67 = vector.broadcast %cst_32 : f32 to vector<8x1xf32>
    %68 = arith.addf %66, %67 : vector<8x1xf32>
    %69 = math.rsqrt %68 : vector<8x1xf32>
    %70 = vector.broadcast %69 : vector<8x1xf32> to vector<8x128xf32>
    %71 = arith.mulf %61, %70 : vector<8x128xf32>
    %c5 = arith.constant 5 : index
    %c0_33 = arith.constant 0 : index
    %72 = vector.load %arg13[%c5, %c0_33] : memref<24x128xf32, #tpu.memory_space<vmem>>, vector<1x128xf32>
    %73 = vector.broadcast %72 : vector<1x128xf32> to vector<8x128xf32>
    %74 = arith.mulf %71, %73 : vector<8x128xf32>
    %c6 = arith.constant 6 : index
    %c0_34 = arith.constant 0 : index
    %75 = vector.load %arg13[%c6, %c0_34] : memref<24x128xf32, #tpu.memory_space<vmem>>, vector<1x128xf32>
    %76 = vector.broadcast %75 : vector<1x128xf32> to vector<8x128xf32>
    %77 = arith.addf %74, %76 : vector<8x128xf32>
    %c7 = arith.constant 7 : index
    %c0_35 = arith.constant 0 : index
    %78 = vector.load %arg13[%c7, %c0_35] : memref<24x128xf32, #tpu.memory_space<vmem>>, vector<1x128xf32>
    %79 = arith.truncf %77 : vector<8x128xf32> to vector<8x128xbf16>
    %c0_36 = arith.constant 0 : index
    %c0_37 = arith.constant 0 : index
    %80 = vector.load %arg6[%c0_36, %c0_37] : memref<128x128xbf16, #tpu.memory_space<vmem>>, vector<128x128xbf16>
    %cst_38 = arith.constant dense<0.000000e+00> : vector<8x128xf32>
    %81 = tpu.matmul %79, %80, %cst_38 {dimension_numbers = #tpu.dot_dimension_numbers<[1], [0], [0], [1], [0, 0, 1, 1], [], []>} : vector<8x128xbf16>, vector<128x128xbf16>, vector<8x128xf32> -> vector<8x128xf32>
    %82 = vector.broadcast %78 : vector<1x128xf32> to vector<8x128xf32>
    %83 = arith.addf %81, %82 : vector<8x128xf32>
    %84 = arith.addf %77, %83 : vector<8x128xf32>
    %cst_39 = arith.constant dense<0.000000e+00> : vector<8xf32>
    %85 = vector.multi_reduction <add>, %84, %cst_39 [1] : vector<8x128xf32> to vector<8xf32>
    %86 = vector.shape_cast %85 : vector<8xf32> to vector<8x1xf32>
    %cst_40 = arith.constant 1.280000e+02 : f32
    %87 = vector.broadcast %cst_40 : f32 to vector<8x1xf32>
    %88 = arith.divf %86, %87 : vector<8x1xf32>
    %89 = vector.broadcast %88 : vector<8x1xf32> to vector<8x128xf32>
    %90 = arith.subf %84, %89 : vector<8x128xf32>
    %91 = arith.mulf %90, %90 : vector<8x128xf32>
    %cst_41 = arith.constant dense<0.000000e+00> : vector<8xf32>
    %92 = vector.multi_reduction <add>, %91, %cst_41 [1] : vector<8x128xf32> to vector<8xf32>
    %93 = vector.shape_cast %92 : vector<8xf32> to vector<8x1xf32>
    %cst_42 = arith.constant 1.280000e+02 : f32
    %94 = vector.broadcast %cst_42 : f32 to vector<8x1xf32>
    %95 = arith.divf %93, %94 : vector<8x1xf32>
    %cst_43 = arith.constant 9.99999974E-6 : f32
    %96 = vector.broadcast %cst_43 : f32 to vector<8x1xf32>
    %97 = arith.addf %95, %96 : vector<8x1xf32>
    %98 = math.rsqrt %97 : vector<8x1xf32>
    %99 = vector.broadcast %98 : vector<8x1xf32> to vector<8x128xf32>
    %100 = arith.mulf %90, %99 : vector<8x128xf32>
    %c8 = arith.constant 8 : index
    %c0_44 = arith.constant 0 : index
    %101 = vector.load %arg13[%c8, %c0_44] : memref<24x128xf32, #tpu.memory_space<vmem>>, vector<1x128xf32>
    %102 = vector.broadcast %101 : vector<1x128xf32> to vector<8x128xf32>
    %103 = arith.mulf %100, %102 : vector<8x128xf32>
    %c9 = arith.constant 9 : index
    %c0_45 = arith.constant 0 : index
    %104 = vector.load %arg13[%c9, %c0_45] : memref<24x128xf32, #tpu.memory_space<vmem>>, vector<1x128xf32>
    %105 = vector.broadcast %104 : vector<1x128xf32> to vector<8x128xf32>
    %106 = arith.addf %103, %105 : vector<8x128xf32>
    %c1_46 = arith.constant 1 : index
    %c0_47 = arith.constant 0 : index
    %107 = vector.load %arg14[%c1_46, %c0_47] : memref<8x512xf32, #tpu.memory_space<vmem>>, vector<1x512xf32>
    %108 = arith.truncf %106 : vector<8x128xf32> to vector<8x128xbf16>
    %c0_48 = arith.constant 0 : index
    %c0_49 = arith.constant 0 : index
    %109 = vector.load %arg7[%c0_48, %c0_49] : memref<128x512xbf16, #tpu.memory_space<vmem>>, vector<128x512xbf16>
    %cst_50 = arith.constant dense<0.000000e+00> : vector<8x512xf32>
    %110 = tpu.matmul %108, %109, %cst_50 {dimension_numbers = #tpu.dot_dimension_numbers<[1], [0], [0], [1], [0, 0, 1, 1], [], []>} : vector<8x128xbf16>, vector<128x512xbf16>, vector<8x512xf32> -> vector<8x512xf32>
    %111 = vector.broadcast %107 : vector<1x512xf32> to vector<8x512xf32>
    %112 = arith.addf %110, %111 : vector<8x512xf32>
    %cst_51 = arith.constant 0.000000e+00 : f32
    %113 = vector.broadcast %cst_51 : f32 to vector<8x512xf32>
    %114 = arith.cmpf ogt, %112, %113 : vector<8x512xf32>
    %cst_52 = arith.constant 0.000000e+00 : f32
    %115 = vector.broadcast %cst_52 : f32 to vector<8x512xf32>
    %116 = arith.minimumf %112, %115 : vector<8x512xf32>
    %117 = math.exp %116 : vector<8x512xf32>
    %cst_53 = arith.constant 1.000000e+00 : f32
    %118 = vector.broadcast %cst_53 : f32 to vector<8x512xf32>
    %119 = arith.subf %117, %118 : vector<8x512xf32>
    %120 = arith.select %114, %112, %119 : vector<8x512xi1>, vector<8x512xf32>
    %c10 = arith.constant 10 : index
    %c0_54 = arith.constant 0 : index
    %121 = vector.load %arg13[%c10, %c0_54] : memref<24x128xf32, #tpu.memory_space<vmem>>, vector<1x128xf32>
    %122 = arith.truncf %120 : vector<8x512xf32> to vector<8x512xbf16>
    %c0_55 = arith.constant 0 : index
    %c0_56 = arith.constant 0 : index
    %123 = vector.load %arg8[%c0_55, %c0_56] : memref<512x128xbf16, #tpu.memory_space<vmem>>, vector<512x128xbf16>
    %cst_57 = arith.constant dense<0.000000e+00> : vector<8x128xf32>
    %124 = tpu.matmul %122, %123, %cst_57 {dimension_numbers = #tpu.dot_dimension_numbers<[1], [0], [0], [1], [0, 0, 1, 1], [], []>} : vector<8x512xbf16>, vector<512x128xbf16>, vector<8x128xf32> -> vector<8x128xf32>
    %125 = vector.broadcast %121 : vector<1x128xf32> to vector<8x128xf32>
    %126 = arith.addf %124, %125 : vector<8x128xf32>
    %127 = arith.addf %106, %126 : vector<8x128xf32>
    %cst_58 = arith.constant dense<0.000000e+00> : vector<8xf32>
    %128 = vector.multi_reduction <add>, %127, %cst_58 [1] : vector<8x128xf32> to vector<8xf32>
    %129 = vector.shape_cast %128 : vector<8xf32> to vector<8x1xf32>
    %cst_59 = arith.constant 1.280000e+02 : f32
    %130 = vector.broadcast %cst_59 : f32 to vector<8x1xf32>
    %131 = arith.divf %129, %130 : vector<8x1xf32>
    %132 = vector.broadcast %131 : vector<8x1xf32> to vector<8x128xf32>
    %133 = arith.subf %127, %132 : vector<8x128xf32>
    %134 = arith.mulf %133, %133 : vector<8x128xf32>
    %cst_60 = arith.constant dense<0.000000e+00> : vector<8xf32>
    %135 = vector.multi_reduction <add>, %134, %cst_60 [1] : vector<8x128xf32> to vector<8xf32>
    %136 = vector.shape_cast %135 : vector<8xf32> to vector<8x1xf32>
    %cst_61 = arith.constant 1.280000e+02 : f32
    %137 = vector.broadcast %cst_61 : f32 to vector<8x1xf32>
    %138 = arith.divf %136, %137 : vector<8x1xf32>
    %cst_62 = arith.constant 9.99999974E-6 : f32
    %139 = vector.broadcast %cst_62 : f32 to vector<8x1xf32>
    %140 = arith.addf %138, %139 : vector<8x1xf32>
    %141 = math.rsqrt %140 : vector<8x1xf32>
    %142 = vector.broadcast %141 : vector<8x1xf32> to vector<8x128xf32>
    %143 = arith.mulf %133, %142 : vector<8x128xf32>
    %c11 = arith.constant 11 : index
    %c0_63 = arith.constant 0 : index
    %144 = vector.load %arg13[%c11, %c0_63] : memref<24x128xf32, #tpu.memory_space<vmem>>, vector<1x128xf32>
    %145 = vector.broadcast %144 : vector<1x128xf32> to vector<8x128xf32>
    %146 = arith.mulf %143, %145 : vector<8x128xf32>
    %c12 = arith.constant 12 : index
    %c0_64 = arith.constant 0 : index
    %147 = vector.load %arg13[%c12, %c0_64] : memref<24x128xf32, #tpu.memory_space<vmem>>, vector<1x128xf32>
    %148 = vector.broadcast %147 : vector<1x128xf32> to vector<8x128xf32>
    %149 = arith.addf %146, %148 : vector<8x128xf32>
    %c13 = arith.constant 13 : index
    %c0_65 = arith.constant 0 : index
    %150 = vector.load %arg13[%c13, %c0_65] : memref<24x128xf32, #tpu.memory_space<vmem>>, vector<1x128xf32>
    %151 = arith.truncf %149 : vector<8x128xf32> to vector<8x128xbf16>
    %c0_66 = arith.constant 0 : index
    %c0_67 = arith.constant 0 : index
    %152 = vector.load %arg9[%c0_66, %c0_67] : memref<128x128xbf16, #tpu.memory_space<vmem>>, vector<128x128xbf16>
    %cst_68 = arith.constant dense<0.000000e+00> : vector<8x128xf32>
    %153 = tpu.matmul %151, %152, %cst_68 {dimension_numbers = #tpu.dot_dimension_numbers<[1], [0], [0], [1], [0, 0, 1, 1], [], []>} : vector<8x128xbf16>, vector<128x128xbf16>, vector<8x128xf32> -> vector<8x128xf32>
    %154 = vector.broadcast %150 : vector<1x128xf32> to vector<8x128xf32>
    %155 = arith.addf %153, %154 : vector<8x128xf32>
    %cst_69 = arith.constant dense<0.000000e+00> : vector<8xf32>
    %156 = vector.multi_reduction <add>, %155, %cst_69 [1] : vector<8x128xf32> to vector<8xf32>
    %157 = vector.shape_cast %156 : vector<8xf32> to vector<8x1xf32>
    %cst_70 = arith.constant 1.280000e+02 : f32
    %158 = vector.broadcast %cst_70 : f32 to vector<8x1xf32>
    %159 = arith.divf %157, %158 : vector<8x1xf32>
    %160 = vector.broadcast %159 : vector<8x1xf32> to vector<8x128xf32>
    %161 = arith.subf %155, %160 : vector<8x128xf32>
    %162 = arith.mulf %161, %161 : vector<8x128xf32>
    %cst_71 = arith.constant dense<0.000000e+00> : vector<8xf32>
    %163 = vector.multi_reduction <add>, %162, %cst_71 [1] : vector<8x128xf32> to vector<8xf32>
    %164 = vector.shape_cast %163 : vector<8xf32> to vector<8x1xf32>
    %cst_72 = arith.constant 1.280000e+02 : f32
    %165 = vector.broadcast %cst_72 : f32 to vector<8x1xf32>
    %166 = arith.divf %164, %165 : vector<8x1xf32>
    %cst_73 = arith.constant 9.99999974E-6 : f32
    %167 = vector.broadcast %cst_73 : f32 to vector<8x1xf32>
    %168 = arith.addf %166, %167 : vector<8x1xf32>
    %169 = math.rsqrt %168 : vector<8x1xf32>
    %170 = vector.broadcast %169 : vector<8x1xf32> to vector<8x128xf32>
    %171 = arith.mulf %161, %170 : vector<8x128xf32>
    %c14 = arith.constant 14 : index
    %c0_74 = arith.constant 0 : index
    %172 = vector.load %arg13[%c14, %c0_74] : memref<24x128xf32, #tpu.memory_space<vmem>>, vector<1x128xf32>
    %173 = vector.broadcast %172 : vector<1x128xf32> to vector<8x128xf32>
    %174 = arith.mulf %171, %173 : vector<8x128xf32>
    %c15 = arith.constant 15 : index
    %c0_75 = arith.constant 0 : index
    %175 = vector.load %arg13[%c15, %c0_75] : memref<24x128xf32, #tpu.memory_space<vmem>>, vector<1x128xf32>
    %176 = vector.broadcast %175 : vector<1x128xf32> to vector<8x128xf32>
    %177 = arith.addf %174, %176 : vector<8x128xf32>
    %c2_76 = arith.constant 2 : index
    %c0_77 = arith.constant 0 : index
    %178 = vector.load %arg14[%c2_76, %c0_77] : memref<8x512xf32, #tpu.memory_space<vmem>>, vector<1x512xf32>
    %179 = arith.truncf %177 : vector<8x128xf32> to vector<8x128xbf16>
    %c0_78 = arith.constant 0 : index
    %c0_79 = arith.constant 0 : index
    %180 = vector.load %arg10[%c0_78, %c0_79] : memref<128x512xbf16, #tpu.memory_space<vmem>>, vector<128x512xbf16>
    %cst_80 = arith.constant dense<0.000000e+00> : vector<8x512xf32>
    %181 = tpu.matmul %179, %180, %cst_80 {dimension_numbers = #tpu.dot_dimension_numbers<[1], [0], [0], [1], [0, 0, 1, 1], [], []>} : vector<8x128xbf16>, vector<128x512xbf16>, vector<8x512xf32> -> vector<8x512xf32>
    %182 = vector.broadcast %178 : vector<1x512xf32> to vector<8x512xf32>
    %183 = arith.addf %181, %182 : vector<8x512xf32>
    %cst_81 = arith.constant 0.000000e+00 : f32
    %184 = vector.broadcast %cst_81 : f32 to vector<8x512xf32>
    %185 = arith.cmpf ogt, %183, %184 : vector<8x512xf32>
    %cst_82 = arith.constant 0.000000e+00 : f32
    %186 = vector.broadcast %cst_82 : f32 to vector<8x512xf32>
    %187 = arith.minimumf %183, %186 : vector<8x512xf32>
    %188 = math.exp %187 : vector<8x512xf32>
    %cst_83 = arith.constant 1.000000e+00 : f32
    %189 = vector.broadcast %cst_83 : f32 to vector<8x512xf32>
    %190 = arith.subf %188, %189 : vector<8x512xf32>
    %191 = arith.select %185, %183, %190 : vector<8x512xi1>, vector<8x512xf32>
    %c16 = arith.constant 16 : index
    %c0_84 = arith.constant 0 : index
    %192 = vector.load %arg13[%c16, %c0_84] : memref<24x128xf32, #tpu.memory_space<vmem>>, vector<1x128xf32>
    %193 = arith.truncf %191 : vector<8x512xf32> to vector<8x512xbf16>
    %c0_85 = arith.constant 0 : index
    %c0_86 = arith.constant 0 : index
    %194 = vector.load %arg11[%c0_85, %c0_86] : memref<512x128xbf16, #tpu.memory_space<vmem>>, vector<512x128xbf16>
    %cst_87 = arith.constant dense<0.000000e+00> : vector<8x128xf32>
    %195 = tpu.matmul %193, %194, %cst_87 {dimension_numbers = #tpu.dot_dimension_numbers<[1], [0], [0], [1], [0, 0, 1, 1], [], []>} : vector<8x512xbf16>, vector<512x128xbf16>, vector<8x128xf32> -> vector<8x128xf32>
    %196 = vector.broadcast %192 : vector<1x128xf32> to vector<8x128xf32>
    %197 = arith.addf %195, %196 : vector<8x128xf32>
    %198 = arith.addf %177, %197 : vector<8x128xf32>
    %cst_88 = arith.constant dense<0.000000e+00> : vector<8xf32>
    %199 = vector.multi_reduction <add>, %198, %cst_88 [1] : vector<8x128xf32> to vector<8xf32>
    %200 = vector.shape_cast %199 : vector<8xf32> to vector<8x1xf32>
    %cst_89 = arith.constant 1.280000e+02 : f32
    %201 = vector.broadcast %cst_89 : f32 to vector<8x1xf32>
    %202 = arith.divf %200, %201 : vector<8x1xf32>
    %203 = vector.broadcast %202 : vector<8x1xf32> to vector<8x128xf32>
    %204 = arith.subf %198, %203 : vector<8x128xf32>
    %205 = arith.mulf %204, %204 : vector<8x128xf32>
    %cst_90 = arith.constant dense<0.000000e+00> : vector<8xf32>
    %206 = vector.multi_reduction <add>, %205, %cst_90 [1] : vector<8x128xf32> to vector<8xf32>
    %207 = vector.shape_cast %206 : vector<8xf32> to vector<8x1xf32>
    %cst_91 = arith.constant 1.280000e+02 : f32
    %208 = vector.broadcast %cst_91 : f32 to vector<8x1xf32>
    %209 = arith.divf %207, %208 : vector<8x1xf32>
    %cst_92 = arith.constant 9.99999974E-6 : f32
    %210 = vector.broadcast %cst_92 : f32 to vector<8x1xf32>
    %211 = arith.addf %209, %210 : vector<8x1xf32>
    %212 = math.rsqrt %211 : vector<8x1xf32>
    %213 = vector.broadcast %212 : vector<8x1xf32> to vector<8x128xf32>
    %214 = arith.mulf %204, %213 : vector<8x128xf32>
    %c17 = arith.constant 17 : index
    %c0_93 = arith.constant 0 : index
    %215 = vector.load %arg13[%c17, %c0_93] : memref<24x128xf32, #tpu.memory_space<vmem>>, vector<1x128xf32>
    %216 = vector.broadcast %215 : vector<1x128xf32> to vector<8x128xf32>
    %217 = arith.mulf %214, %216 : vector<8x128xf32>
    %c18 = arith.constant 18 : index
    %c0_94 = arith.constant 0 : index
    %218 = vector.load %arg13[%c18, %c0_94] : memref<24x128xf32, #tpu.memory_space<vmem>>, vector<1x128xf32>
    %219 = vector.broadcast %218 : vector<1x128xf32> to vector<8x128xf32>
    %220 = arith.addf %217, %219 : vector<8x128xf32>
    %c19 = arith.constant 19 : index
    %c0_95 = arith.constant 0 : index
    %221 = vector.load %arg13[%c19, %c0_95] : memref<24x128xf32, #tpu.memory_space<vmem>>, vector<1x128xf32>
    %222 = arith.truncf %220 : vector<8x128xf32> to vector<8x128xbf16>
    %c0_96 = arith.constant 0 : index
    %c0_97 = arith.constant 0 : index
    %223 = vector.load %arg12[%c0_96, %c0_97] : memref<128x128xbf16, #tpu.memory_space<vmem>>, vector<128x128xbf16>
    %cst_98 = arith.constant dense<0.000000e+00> : vector<8x128xf32>
    %224 = tpu.matmul %222, %223, %cst_98 {dimension_numbers = #tpu.dot_dimension_numbers<[1], [0], [0], [1], [0, 0, 1, 1], [], []>} : vector<8x128xbf16>, vector<128x128xbf16>, vector<8x128xf32> -> vector<8x128xf32>
    %225 = vector.broadcast %221 : vector<1x128xf32> to vector<8x128xf32>
    %226 = arith.addf %224, %225 : vector<8x128xf32>
    %c0_99 = arith.constant 0 : index
    %c0_100 = arith.constant 0 : index
    %227 = vector.load %arg15[%c0_99, %c0_100] : memref<8x128xf32, #tpu.memory_space<vmem>>, vector<8x128xf32>
    tpu.vector_store %arg15[%c0_99, %c0_100], %226 {strides = array<i32>} : memref<8x128xf32, #tpu.memory_space<vmem>>, vector<8x128xf32>,
    return
  }
  func.func @transform_0(%arg0: i32) -> (i32, i32) {
    %c0_i32 = arith.constant 0 : i32
    %c0_i32_0 = arith.constant 0 : i32
    return %arg0, %c0_i32 : i32, i32
  }
  func.func @transform_1(%arg0: i32) -> (i32, i32) {
    %c0_i32 = arith.constant 0 : i32
    %c0_i32_0 = arith.constant 0 : i32
    %c0_i32_1 = arith.constant 0 : i32
    return %c0_i32, %c0_i32_0 : i32, i32
  }
  func.func @transform_2(%arg0: i32) -> (i32, i32) {
    %c0_i32 = arith.constant 0 : i32
    %c0_i32_0 = arith.constant 0 : i32
    %c0_i32_1 = arith.constant 0 : i32
    return %c0_i32, %c0_i32_0 : i32, i32
  }
  func.func @transform_3(%arg0: i32) -> (i32, i32) {
    %c0_i32 = arith.constant 0 : i32
    %c0_i32_0 = arith.constant 0 : i32
    %c0_i32_1 = arith.constant 0 : i32
    return %c0_i32, %c0_i32_0 : i32, i32
  }
  func.func @transform_4(%arg0: i32) -> (i32, i32) {
    %c0_i32 = arith.constant 0 : i32
    %c0_i32_0 = arith.constant 0 : i32
    %c0_i32_1 = arith.constant 0 : i32
    return %c0_i32, %c0_i32_0 : i32, i32
  }
  func.func @transform_5(%arg0: i32) -> (i32, i32) {
    %c0_i32 = arith.constant 0 : i32
    %c0_i32_0 = arith.constant 0 : i32
    %c0_i32_1 = arith.constant 0 : i32
    return %c0_i32, %c0_i32_0 : i32, i32
  }
  func.func @transform_6(%arg0: i32) -> (i32, i32) {
    %c0_i32 = arith.constant 0 : i32
    %c0_i32_0 = arith.constant 0 : i32
    %c0_i32_1 = arith.constant 0 : i32
    return %c0_i32, %c0_i32_0 : i32, i32
  }
  func.func @transform_7(%arg0: i32) -> (i32, i32) {
    %c0_i32 = arith.constant 0 : i32
    %c0_i32_0 = arith.constant 0 : i32
    %c0_i32_1 = arith.constant 0 : i32
    return %c0_i32, %c0_i32_0 : i32, i32
  }
  func.func @transform_8(%arg0: i32) -> (i32, i32) {
    %c0_i32 = arith.constant 0 : i32
    %c0_i32_0 = arith.constant 0 : i32
    %c0_i32_1 = arith.constant 0 : i32
    return %c0_i32, %c0_i32_0 : i32, i32
  }
  func.func @transform_9(%arg0: i32) -> (i32, i32) {
    %c0_i32 = arith.constant 0 : i32
    %c0_i32_0 = arith.constant 0 : i32
    %c0_i32_1 = arith.constant 0 : i32
    return %c0_i32, %c0_i32_0 : i32, i32
  }
  func.func @transform_10(%arg0: i32) -> (i32, i32) {
    %c0_i32 = arith.constant 0 : i32
    %c0_i32_0 = arith.constant 0 : i32
    %c0_i32_1 = arith.constant 0 : i32
    return %c0_i32, %c0_i32_0 : i32, i32
  }
  func.func @transform_11(%arg0: i32) -> (i32, i32) {
    %c0_i32 = arith.constant 0 : i32
    %c0_i32_0 = arith.constant 0 : i32
    %c0_i32_1 = arith.constant 0 : i32
    return %c0_i32, %c0_i32_0 : i32, i32
  }
  func.func @transform_12(%arg0: i32) -> (i32, i32) {
    %c0_i32 = arith.constant 0 : i32
    %c0_i32_0 = arith.constant 0 : i32
    %c0_i32_1 = arith.constant 0 : i32
    return %c0_i32, %c0_i32_0 : i32, i32
  }
  func.func @transform_13(%arg0: i32) -> (i32, i32) {
    %c0_i32 = arith.constant 0 : i32
    %c0_i32_0 = arith.constant 0 : i32
    %c0_i32_1 = arith.constant 0 : i32
    return %c0_i32, %c0_i32_0 : i32, i32
  }
  func.func @transform_14(%arg0: i32) -> (i32, i32) {
    %c0_i32 = arith.constant 0 : i32
    %c0_i32_0 = arith.constant 0 : i32
    return %arg0, %c0_i32 : i32, i32
  }
}

</mosaic_0001>

<bundles_post_ra>
// kernel: motion_transformer.1
= control target key start
LH: loop header
LB: loop body
LE: loop exit
PB: predicated region body
PF: predicated region fallthrough
CT: control target
= control target key end

     0   :  { %v3609_v0 = vmov 0.0   ;;  %vm3610_vm0 = vmmov 0   ;;  %s4549_s1 = inlined_call_operand.vmem [shape: bf16[128,128], index: 1, kind: input, shape index: {}]   ;;  %s4550_s2 = inlined_call_operand.vmem [shape: bf16[128,128], index: 2, kind: input, shape index: {}]   ;;  %s4551_s0 = inlined_call_operand.vmem [shape: f32[8,128], index: 0, kind: input, shape index: {}]   ;;  %s4552_s12 = inlined_call_operand.vmem [shape: f32[24,128], index: 12, kind: input, shape index: {}]   ;;  %s4553_s3 = inlined_call_operand.vmem [shape: bf16[128,512], index: 3, kind: input, shape index: {}]   ;;  %s4554_s4 = inlined_call_operand.vmem [shape: bf16[512,128], index: 4, kind: input, shape index: {}]   ;;  %s4555_s13 = inlined_call_operand.vmem [shape: f32[8,512], index: 13, kind: input, shape index: {}]   ;;  %s4556_s5 = inlined_call_operand.vmem [shape: bf16[128,128], index: 5, kind: input, shape index: {}]   ;;  %s4557_s6 = inlined_call_operand.vmem [shape: bf16[128,512], index: 6, kind: input, shape index: {}]   ;;  %s4558_s7 = inlined_call_operand.vmem [shape: bf16[512,128], index: 7, kind: input, shape index: {}]   ;;  %s4559_s8 = inlined_call_operand.vmem [shape: bf16[128,128], index: 8, kind: input, shape index: {}]   ;;  %s4560_s9 = inlined_call_operand.vmem [shape: bf16[128,512], index: 9, kind: input, shape index: {}]   ;;  %s4561_s10 = inlined_call_operand.vmem [shape: bf16[512,128], index: 10, kind: input, shape index: {}]   ;;  %s4562_s11 = inlined_call_operand.vmem [shape: bf16[128,128], index: 11, kind: input, shape index: {}]   ;;  %s4563_s14 = inlined_call_operand.vmem [shape: f32[8,128], index: 14, kind: output, shape index: {}]  }
   0x1   :  { %3190 = vmatprep.subr.bf16.mxu0 %v3609_v0  ;;  %v3293_v1 = vld [vmem:[%s4549_s1] sm:$0xff]   ;;  %3206 = vmatprep.mubr.msk.bf16.mxu0 %vm3610_vm0, %v3609_v0  ;;  %v3294_v2 = vld [vmem:[%s4549_s1 + $0x8] sm:$0xff]   ;;  %v3295_v3 = vld [vmem:[%s4549_s1 + $0x10] sm:$0xff]  }
   0x2   :  { %3210 = vmatprep.subr.bf16.mxu1 %v3609_v0  ;;  %3226 = vmatprep.mubr.msk.bf16.mxu1 %vm3610_vm0, %v3609_v0  ;;  %v3301_v4 = vld [vmem:[%s4550_s2] sm:$0xff]   ;;  %v3296_v5 = vld [vmem:[%s4549_s1 + $0x18] sm:$0xff]   ;;  %v3302_v6 = vld [vmem:[%s4550_s2 + $0x8] sm:$0xff]  }
   0x3   :  { %3191 = vmatpush3.bf16.msra.mxu0 %v3293_v1  ;;  %3211 = vmatpush3.bf16.msra.mxu1 %v3301_v4  ;;  %v3297_v7 = vld [vmem:[%s4549_s1 + $0x20] sm:$0xff]   ;;  %v3303_v8 = vld [vmem:[%s4550_s2 + $0x10] sm:$0xff]   ;;  %v3298_v9 = vld [vmem:[%s4549_s1 + $0x28] sm:$0xff]  }
   0x4   :  { %3192 = vmatprep.subr.bf16.mxu0 %v3609_v0  ;;  %3212 = vmatprep.subr.bf16.mxu1 %v3609_v0  ;;  %v3304_v10 = vld [vmem:[%s4550_s2 + $0x18] sm:$0xff]   ;;  %v3299_v11 = vld [vmem:[%s4549_s1 + $0x30] sm:$0xff]   ;;  %v3305_v12 = vld [vmem:[%s4550_s2 + $0x20] sm:$0xff]  }
   0x5   :  { %v3300_v13 = vld [vmem:[%s4549_s1 + $0x38] sm:$0xff]   ;;  %v48_v14 = vld [vmem:[%s4551_s0] sm:$0xff]  ;;  %v3306_v15 = vld [vmem:[%s4550_s2 + $0x28] sm:$0xff]  }
   0x6   :  { %v50_v16 = vpack.c.bf16 %v48_v14, %v48_v14  ;;  %v3307_v17 = vld [vmem:[%s4550_s2 + $0x30] sm:$0xff]   ;;  %v3308_v18 = vld [vmem:[%s4550_s2 + $0x38] sm:$0xff]   ;;  %v2747_v19 = vld [vmem:[%s4552_s12] ss:$0 sm:$0xff] }
   0x7   :  { %3193 = vmatpush3.bf16.msra.mxu0 %v3294_v2  ;;  %3213 = vmatpush3.bf16.msra.mxu1 %v3302_v6  ;;  %v2756_v26 = vld [vmem:[%s4552_s12 + $0x1] ss:$0 sm:$0xff]  ;;  %v3311_v33 = vld [vmem:[%s4553_s3 + $0x4] ss:$16 sps:$4 sm:$0xff]   ;;  %v3312_v34 = vld [vmem:[%s4553_s3 + $0x8] ss:$16 sps:$4 sm:$0xff]  }
   0x8   :  { %3194 = vmatprep.subr.bf16.mxu0 %v3609_v0  ;;  %3214 = vmatprep.subr.bf16.mxu1 %v3609_v0  ;;  %v3309_v32 = vld [vmem:[%s4553_s3] ss:$16 sps:$4 sm:$0xff]   ;;  %v3314_v35 = vld [vmem:[%s4553_s3 + $0xc] ss:$16 sps:$4 sm:$0xff]   ;;  %v3317_v37 = vld [vmem:[%s4553_s3 + $0x24] ss:$16 sps:$4 sm:$0xff]  }
   0x9   :  { %v3315_v36 = vld [vmem:[%s4553_s3 + $0x20] ss:$16 sps:$4 sm:$0xff]   ;;  %v3318_v38 = vld [vmem:[%s4553_s3 + $0x28] ss:$16 sps:$4 sm:$0xff]   ;;  %v3320_v39 = vld [vmem:[%s4553_s3 + $0x2c] ss:$16 sps:$4 sm:$0xff]  }
   0xa   :  { %v3321_v40 = vld [vmem:[%s4553_s3 + $0x40] ss:$16 sps:$4 sm:$0xff]   ;;  %v3323_v41 = vld [vmem:[%s4553_s3 + $0x44] ss:$16 sps:$4 sm:$0xff]   ;;  %v3324_v42 = vld [vmem:[%s4553_s3 + $0x48] ss:$16 sps:$4 sm:$0xff]  }
   0xb   :  { %3195 = vmatpush3.bf16.msra.mxu0 %v3295_v3  ;;  %3215 = vmatpush3.bf16.msra.mxu1 %v3303_v8  ;;  %v3326_v43 = vld [vmem:[%s4553_s3 + $0x4c] ss:$16 sps:$4 sm:$0xff]   ;;  %v3329_v48 = vld [vmem:[%s4553_s3 + $0x64] ss:$16 sps:$4 sm:$0xff]   ;;  %v3327_v50 = vld [vmem:[%s4553_s3 + $0x60] ss:$16 sps:$4 sm:$0xff]  }
   0xc   :  { %3196 = vmatprep.subr.bf16.mxu0 %v3609_v0  ;;  %3216 = vmatprep.subr.bf16.mxu1 %v3609_v0  ;;  %v3332_v49 = vld [vmem:[%s4553_s3 + $0x6c] ss:$16 sps:$4 sm:$0xff]   ;;  %v3330_v51 = vld [vmem:[%s4553_s3 + $0x68] ss:$16 sps:$4 sm:$0xff]   ;;  %v3335_v52 = vld [vmem:[%s4553_s3 + $0x84] ss:$16 sps:$4 sm:$0xff]  }
   0xd   :  { %v3338_v53 = vld [vmem:[%s4553_s3 + $0x8c] ss:$16 sps:$4 sm:$0xff]   ;;  %v3333_v54 = vld [vmem:[%s4553_s3 + $0x80] ss:$16 sps:$4 sm:$0xff]   ;;  %v3336_v55 = vld [vmem:[%s4553_s3 + $0x88] ss:$16 sps:$4 sm:$0xff]  }
   0xe   :  { %v3341_v56 = vld [vmem:[%s4553_s3 + $0xa4] ss:$16 sps:$4 sm:$0xff]   ;;  %v3344_v57 = vld [vmem:[%s4553_s3 + $0xac] ss:$16 sps:$4 sm:$0xff]   ;;  %v3339_v58 = vld [vmem:[%s4553_s3 + $0xa0] ss:$16 sps:$4 sm:$0xff]  }
   0xf   :  { %3197 = vmatpush3.bf16.msra.mxu0 %v3296_v5  ;;  %3217 = vmatpush3.bf16.msra.mxu1 %v3304_v10  ;;  %v3342_v59 = vld [vmem:[%s4553_s3 + $0xa8] ss:$16 sps:$4 sm:$0xff]   ;;  %v3347_v60 = vld [vmem:[%s4553_s3 + $0xc4] ss:$16 sps:$4 sm:$0xff]   ;;  %v3350_v61 = vld [vmem:[%s4553_s3 + $0xcc] ss:$16 sps:$4 sm:$0xff]  }
  0x10   :  { %3198 = vmatprep.subr.bf16.mxu0 %v3609_v0  ;;  %3218 = vmatprep.subr.bf16.mxu1 %v3609_v0  ;;  %v3345_v62 = vld [vmem:[%s4553_s3 + $0xc0] ss:$16 sps:$4 sm:$0xff]   ;;  %v3348_v63 = vld [vmem:[%s4553_s3 + $0xc8] ss:$16 sps:$4 sm:$0xff]   ;;  %v3353_v2 = vld [vmem:[%s4553_s3 + $0xe4] ss:$16 sps:$4 sm:$0xff]  }
  0x11   :  { %v3351_v1 = vld [vmem:[%s4553_s3 + $0xe0] ss:$16 sps:$4 sm:$0xff]   ;;  %v3354_v3 = vld [vmem:[%s4553_s3 + $0xe8] ss:$16 sps:$4 sm:$0xff]   ;;  %v3356_v4 = vld [vmem:[%s4553_s3 + $0xec] ss:$16 sps:$4 sm:$0xff]  }
  0x12   :  { %v3611_v5 = vmov 0   ;;  %v3357_v6 = vld [vmem:[%s4554_s4 + $0x40] sm:$0xff]  }
  0x13   :  { %3199 = vmatpush3.bf16.msra.mxu0 %v3297_v7  ;;  %3219 = vmatpush3.bf16.msra.mxu1 %v3305_v12  ;;  %v3358_v7 = vld [vmem:[%s4554_s4 + $0xc0] sm:$0xff]  }
  0x14   :  { %3200 = vmatprep.subr.bf16.mxu0 %v3609_v0  ;;  %3220 = vmatprep.subr.bf16.mxu1 %v3609_v0  ;;  %v2765_v12 = vld [vmem:[%s4552_s12 + $0x2] ss:$0 sm:$0xff]  ;;  %v2766_v14 = vld [vmem:[%s4552_s12 + $0x3] ss:$0 sm:$0xff] }
  0x17   :  { %3201 = vmatpush3.bf16.msra.mxu0 %v3298_v9  ;;  %3221 = vmatpush3.bf16.msra.mxu1 %v3306_v15 }
  0x18   :  { %3202 = vmatprep.subr.bf16.mxu0 %v3609_v0  ;;  %3222 = vmatprep.subr.bf16.mxu1 %v3609_v0 }
  0x1b   :  { %3203 = vmatpush3.bf16.msra.mxu0 %v3299_v11  ;;  %3223 = vmatpush3.bf16.msra.mxu1 %v3307_v17  ;;  %v3359_v17 = vld [vmem:[%s4554_s4] sm:$0xff]  }
  0x1c   :  { %3204 = vmatprep.subr.bf16.mxu0 %v3609_v0  ;;  %3224 = vmatprep.subr.bf16.mxu1 %v3609_v0 }
  0x1f   :  { %3205 = vmatpush3.bf16.msra.mxu0 %v3300_v13  ;;  %3225 = vmatpush3.bf16.msra.mxu1 %v3308_v18  ;;  %v3360_v18 = vld [vmem:[%s4554_s4 + $0x80] sm:$0xff]  }
  0x20   :  { %508 = vmatprep.subr.bf16.mxu0 %v3311_v33  ;;  %549 = vmatprep.subr.bf16.mxu1 %v3314_v35  ;;  %v3374_v33 = vld [vmem:[%s4554_s4 + $0xe0] sm:$0xff]  }
  0x21   :  { %v3376_v35 = vld [vmem:[%s4554_s4 + $0xa0] sm:$0xff]  }
  0x22   :  { %3207 = vmatmul.mubr.bf16.vlgmr.msra.gmra.mrb[0].mxu0 %v50_v16 }
  0x23   :  { %509 = vmatpush1.bf16.msra.mxu0 %v3309_v32  ;;  %540 = vmatprep.mubr.bf16.mxu0 %v3611_v5  ;;  %v3373_v32 = vld [vmem:[%s4554_s4 + $0x60] sm:$0xff]  }
  0x24   :  { %510 = vmatprep.subr.bf16.mxu0 %v3317_v37  ;;  %v3378_v37 = vld [vmem:[%s4554_s4 + $0xe8] sm:$0xff]  }
  0x27   :  { %511 = vmatpush1.bf16.msra.mxu0 %v3315_v36  ;;  %v3377_v36 = vld [vmem:[%s4554_s4 + $0x68] sm:$0xff]  }
  0x28   :  { %512 = vmatprep.subr.bf16.mxu0 %v3323_v41  ;;  %v3382_v41 = vld [vmem:[%s4554_s4 + $0xf0] sm:$0xff]  }
  0x2b   :  { %513 = vmatpush1.bf16.msra.mxu0 %v3321_v40  ;;  %v3381_v40 = vld [vmem:[%s4554_s4 + $0x70] sm:$0xff]  }
  0x2c   :  { %514 = vmatprep.subr.bf16.mxu0 %v3329_v48  ;;  %v328_v48 = vlaneseq }
  0x2f   :  { %515 = vmatpush1.bf16.msra.mxu0 %v3327_v50 }
  0x30   :  { %516 = vmatprep.subr.bf16.mxu0 %v3335_v52  ;;  %v293_v52 = vld [vmem:[%s4555_s13] ss:$8 sm:$0xf] }
  0x33   :  { %517 = vmatpush1.bf16.msra.mxu0 %v3333_v54 }
  0x34   :  { %518 = vmatprep.subr.bf16.mxu0 %v3341_v56 }
  0x37   :  { %519 = vmatpush1.bf16.msra.mxu0 %v3339_v58 }
  0x38   :  { %520 = vmatprep.subr.bf16.mxu0 %v3347_v60 }
  0x3b   :  { %521 = vmatpush1.bf16.msra.mxu0 %v3345_v62 }
  0x3c   :  { %522 = vmatprep.subr.bf16.mxu0 %v3353_v2 }
  0x3f   :  { %523 = vmatpush1.bf16.msra.mxu0 %v3351_v1 }
  0x40   :  { %3031 = vmatprep.subr.bf16.mxu0 %v3357_v6 }
  0xf5   :  { %v153_v20 = vpop.f32.mrb[0].mxu0 }
  0xf6   :  { %v154_v21 = vadd.f32 %v2747_v19, %v153_v20  ;;  %v3208_v22 = vpop.f32.mrb[1].mxu0  ;;  %v3361_v20 = vld [vmem:[%s4554_s4 + $0x48] sm:$0xff]  }
  0xf7   :  { %v156_v23 = vpop.f32.mrb[2].mxu0  ;;  %v3363_v22 = vld [vmem:[%s4554_s4 + $0x8] sm:$0xff]  }
  0xf8   :  { %v160_v24 = vpack.c.bf16 %v154_v21, %v154_v21  ;;  %v3209_v25 = vpop.f32.mrb[3].mxu0  ;;  %v3362_v21 = vld [vmem:[%s4554_s4 + $0xc8] sm:$0xff]  }
  0xf9   :  { %v3364_v23 = vld [vmem:[%s4554_s4 + $0x88] sm:$0xff]   ;;  %v3366_v25 = vld [vmem:[%s4554_s4 + $0xd0] sm:$0xff]  }
  0xfa   :  { %3227 = vmatmul.mubr.bf16.vlgmr.msra.gmra.mrb[0].mxu1 %v160_v24  ;;  %v3365_v24 = vld [vmem:[%s4554_s4 + $0x50] sm:$0xff]  }
  0xfb   :  { %550 = vmatpush1.bf16.msra.mxu1 %v3312_v34  ;;  %581 = vmatprep.mubr.bf16.mxu1 %v3611_v5  ;;  %v3375_v34 = vld [vmem:[%s4554_s4 + $0x20] sm:$0xff]  }
  0xfc   :  { %551 = vmatprep.subr.bf16.mxu1 %v3320_v39  ;;  %v3380_v39 = vld [vmem:[%s4554_s4 + $0xa8] sm:$0xff]  }
  0xff   :  { %552 = vmatpush1.bf16.msra.mxu1 %v3318_v38  ;;  %v3379_v38 = vld [vmem:[%s4554_s4 + $0x28] sm:$0xff]  }
 0x100   :  { %553 = vmatprep.subr.bf16.mxu1 %v3326_v43  ;;  %v3384_v43 = vld [vmem:[%s4554_s4 + $0xb0] sm:$0xff]  }
 0x103   :  { %554 = vmatpush1.bf16.msra.mxu1 %v3324_v42  ;;  %v3383_v42 = vld [vmem:[%s4554_s4 + $0x30] sm:$0xff]  }
 0x104   :  { %555 = vmatprep.subr.bf16.mxu1 %v3332_v49  ;;  %v329_v49 = vshrl.u32 %v328_v48, 7  ;;  %v3389_v48 = vld [vmem:[%s4556_s5] sm:$0xff]  }
 0x106   :  { %v3969_v50 = vsub.s32 0, %v329_v49  ;;  %v3978_v54 = vsub.s32 3, %v329_v49 }
 0x107   :  { %556 = vmatpush1.bf16.msra.mxu1 %v3330_v51  ;;  %v3971_v51 = vsub.s32 2, %v329_v49 }
 0x108   :  { %557 = vmatprep.subr.bf16.mxu1 %v3338_v53  ;;  %v3976_v53 = vsub.s32 1, %v329_v49  ;;  %v343_v58 = vrot.slane %v293_v52, %v3978_v54  ;;  %v3390_v49 = vld [vmem:[%s4556_s5 + $0x8] sm:$0xff]  }
 0x109   :  { %v339_v56 = vrot.slane %v293_v52, %v3971_v51 }
 0x10b   :  { %558 = vmatpush1.bf16.msra.mxu1 %v3336_v55  ;;  %v331_v55 = vrot.slane %v293_v52, %v3969_v50 }
 0x10c   :  { %559 = vmatprep.subr.bf16.mxu1 %v3344_v57  ;;  %v335_v57 = vrot.slane %v293_v52, %v3976_v53 }
 0x10f   :  { %560 = vmatpush1.bf16.msra.mxu1 %v3342_v59 }
 0x110   :  { %561 = vmatprep.subr.bf16.mxu1 %v3350_v61 }
 0x113   :  { %562 = vmatpush1.bf16.msra.mxu1 %v3348_v63 }
 0x114   :  { %563 = vmatprep.subr.bf16.mxu1 %v3356_v4 }
 0x117   :  { %564 = vmatpush1.bf16.msra.mxu1 %v3354_v3 }
 0x118   :  { %3053 = vmatprep.subr.bf16.mxu1 %v3358_v7 }
 0x1cd   :  { %v263_v27 = vpop.f32.mrb[0].mxu1 }
 0x1ce   :  { %v264_v28 = vadd.f32 %v2756_v26, %v263_v27  ;;  %v3228_v29 = vpop.f32.mrb[1].mxu1  ;;  %v3367_v26 = vld [vmem:[%s4554_s4 + $0x10] sm:$0xff]  }
 0x1cf   :  { %v266_v30 = vpop.f32.mrb[2].mxu1  ;;  %v3368_v27 = vld [vmem:[%s4554_s4 + $0x90] sm:$0xff]   ;;  %v3370_v29 = vld [vmem:[%s4554_s4 + $0xd8] sm:$0xff]  }
 0x1d0   :  { %269 = vadd.xlane.f32.xlu0 %v264_v28  ;;  %v3229_v31 = vpop.f32.mrb[3].mxu1  ;;  %v3371_v30 = vld [vmem:[%s4554_s4 + $0x18] sm:$0xff]  }
 0x1d1   :  { %v3372_v31 = vld [vmem:[%s4554_s4 + $0x98] sm:$0xff]  }
 0x25d   :  { %v270_v44 = vpop.xlane.xlu0 %269 }
 0x25e   :  { %v272_v45 = vmul.f32 0.0078125, %v270_v44  ;;  %v3385_v44 = vld [vmem:[%s4554_s4 + $0x78] sm:$0xff]  }
 0x260   :  { %v273_v46 = vsub.f32 %v264_v28, %v272_v45  ;;  %v3369_v28 = vld [vmem:[%s4554_s4 + $0x58] sm:$0xff]  }
 0x261   :  { %v3386_v45 = vld [vmem:[%s4554_s4 + $0xf8] sm:$0xff]  }
 0x262   :  { %v274_v47 = vmul.f32 %v273_v46, %v273_v46 }
 0x264   :  { %275 = vadd.xlane.f32.xlu0 %v274_v47  ;;  %v3388_v47 = vld [vmem:[%s4554_s4 + $0xb8] sm:$0xff]  }
 0x2f1   :  { %v276_v8 = vpop.xlane.xlu0 %275 }
 0x2f2   :  { %v277_v9 = vmul.f32 0.0078125, %v276_v8 }
 0x2f4   :  { %v278_v10 = vadd.f32 1e-05, %v277_v9 }
 0x2f6   :  { %3573 = vrsqrt.f32 %v278_v10 }
 0x300   :  { %v3574_v11 = vpop.eup %3573 }
 0x301   :  { %v280_v13 = vmul.f32 %v3574_v11, %v273_v46  ;;  %v3387_v46 = vld [vmem:[%s4554_s4 + $0x38] sm:$0xff]  }
 0x303   :  { %v286_v15 = vmul.f32 %v2765_v12, %v280_v13 }
 0x305   :  { %v3874_v16 = vadd.f32 %v2766_v14, %v286_v15 }
 0x307   :  { %v294_v19 = vpack.c.bf16 %v3874_v16, %v3874_v16 }
 0x309   :  { %541 = vmatmul.mubr.bf16.vlgmr.msra.gmra.mrb[4].mxu0 %v294_v19  ;;  %582 = vmatmul.mubr.bf16.vlgmr.msra.gmra.mrb[4].mxu1 %v294_v19 }
 0x30a   :  { %3032 = vmatpush3.bf16.msra.mxu0 %v3359_v17  ;;  %3054 = vmatpush3.bf16.msra.mxu1 %v3360_v18 }
 0x30b   :  { %3033 = vmatprep.subr.bf16.mxu0 %v3361_v20  ;;  %3055 = vmatprep.subr.bf16.mxu1 %v3362_v21 }
 0x30e   :  { %3034 = vmatpush3.bf16.msra.mxu0 %v3363_v22  ;;  %3056 = vmatpush3.bf16.msra.mxu1 %v3364_v23 }
 0x30f   :  { %3035 = vmatprep.subr.bf16.mxu0 %v3365_v24  ;;  %3057 = vmatprep.subr.bf16.mxu1 %v3366_v25 }
 0x312   :  { %3036 = vmatpush3.bf16.msra.mxu0 %v3367_v26  ;;  %3058 = vmatpush3.bf16.msra.mxu1 %v3368_v27 }
 0x313   :  { %3037 = vmatprep.subr.bf16.mxu0 %v3369_v28  ;;  %3059 = vmatprep.subr.bf16.mxu1 %v3370_v29 }
 0x316   :  { %3038 = vmatpush3.bf16.msra.mxu0 %v3371_v30  ;;  %3060 = vmatpush3.bf16.msra.mxu1 %v3372_v31 }
 0x317   :  { %3039 = vmatprep.subr.bf16.mxu0 %v3373_v32  ;;  %3061 = vmatprep.subr.bf16.mxu1 %v3374_v33 }
 0x31a   :  { %3040 = vmatpush3.bf16.msra.mxu0 %v3375_v34  ;;  %3062 = vmatpush3.bf16.msra.mxu1 %v3376_v35 }
 0x31b   :  { %3041 = vmatprep.subr.bf16.mxu0 %v3377_v36  ;;  %3063 = vmatprep.subr.bf16.mxu1 %v3378_v37  ;;  %v2803_v36 = vld [vmem:[%s4552_s12 + $0x4] ss:$0 sm:$0xff] }
 0x31e   :  { %3042 = vmatpush3.bf16.msra.mxu0 %v3379_v38  ;;  %3064 = vmatpush3.bf16.msra.mxu1 %v3380_v39 }
 0x31f   :  { %3043 = vmatprep.subr.bf16.mxu0 %v3381_v40  ;;  %3065 = vmatprep.subr.bf16.mxu1 %v3382_v41 }
 0x322   :  { %3044 = vmatpush3.bf16.msra.mxu0 %v3383_v42  ;;  %3066 = vmatpush3.bf16.msra.mxu1 %v3384_v43 }
 0x323   :  { %3045 = vmatprep.subr.bf16.mxu0 %v3385_v44  ;;  %3067 = vmatprep.subr.bf16.mxu1 %v3386_v45 }
 0x326   :  { %3046 = vmatpush3.bf16.msra.mxu0 %v3387_v46  ;;  %3068 = vmatpush3.bf16.msra.mxu1 %v3388_v47 }
 0x327   :  { %3230 = vmatprep.subr.bf16.mxu0 %v3609_v0 }
 0x3dc   :  { %v542_v59 = vpop.f32.mrb[4].mxu0  ;;  %v583_v60 = vpop.f32.mrb[4].mxu1 }
 0x3dd   :  { %v543_v61 = vadd.f32 %v542_v59, %v331_v55  ;;  %v584_v62 = vadd.f32 %v583_v60, %v339_v56  ;;  %v544_v63 = vpop.f32.mrb[5].mxu0  ;;  %v585_v1 = vpop.f32.mrb[5].mxu1  ;;  %v3393_v59 = vld [vmem:[%s4556_s5 + $0x20] sm:$0xff]   ;;  %v3394_v60 = vld [vmem:[%s4556_s5 + $0x28] sm:$0xff]  }
 0x3de   :  { %v545_v2 = vadd.f32 %v544_v63, %v335_v57  ;;  %v586_v3 = vadd.f32 %v585_v1, %v343_v58  ;;  %v546_v4 = vpop.f32.mrb[6].mxu0  ;;  %v587_v6 = vpop.f32.mrb[6].mxu1  ;;  %v3392_v58 = vld [vmem:[%s4556_s5 + $0x18] sm:$0xff]  }
 0x3df   :  { %v594_v7 = vmin.f32 %v543_v61, 0.0  ;;  %v596_v8 = vmin.f32 %v584_v62, 0.0  ;;  %v547_v9 = vpop.f32.mrb[7].mxu0  ;;  %v588_v10 = vpop.f32.mrb[7].mxu1  ;;  %vm590_vm1 = vcmp.gt.f32.partialorder %v543_v61, 0.0  ;;  %vm592_vm2 = vcmp.gt.f32.partialorder %v584_v62, 0.0 }
 0x3e0   :  { %v595_v11 = vmin.f32 %v545_v2, 0.0  ;;  %v597_v12 = vmin.f32 %v586_v3, 0.0  ;;  %vm591_vm3 = vcmp.gt.f32.partialorder %v545_v2, 0.0  ;;  %vm593_vm4 = vcmp.gt.f32.partialorder %v586_v3, 0.0  ;;  %v2836_v4 = vld [vmem:[%s4552_s12 + $0x5] ss:$0 sm:$0xff] }
 0x3e1   :  { %v598_v13 = vmul.f32 1.442695, %v594_v7  ;;  %v602_v14 = vmul.f32 1.442695, %v596_v8  ;;  %v2837_v7 = vld [vmem:[%s4552_s12 + $0x6] ss:$0 sm:$0xff] }
 0x3e2   :  { %v600_v15 = vmul.f32 1.442695, %v595_v11  ;;  %v604_v17 = vmul.f32 1.442695, %v597_v12  ;;  %v2838_v11 = vld [vmem:[%s4552_s12 + $0x7] ss:$0 sm:$0xff] }
 0x3e3   :  { %3575 = vpow2.f32 %v598_v13 }
 0x3e4   :  { %3577 = vpow2.f32 %v602_v14 }
 0x3e5   :  { %3579 = vpow2.f32 %v600_v15 }
 0x3e6   :  { %3581 = vpow2.f32 %v604_v17 }
 0x3ed   :  { %v3576_v18 = vpop.eup %3575 }
 0x3ee   :  { %v3578_v19 = vpop.eup %3577  ;;  %v2799_v20 = vadd.f32 -1.0, %v3576_v18 }
 0x3ef   :  { %v3580_v21 = vpop.eup %3579  ;;  %v2801_v22 = vadd.f32 -1.0, %v3578_v19  ;;  %v3397_v19 = vld [vmem:[%s4557_s6] ss:$16 sps:$4 sm:$0xff]  }
 0x3f0   :  { %v3582_v23 = vpop.eup %3581  ;;  %v2800_v24 = vadd.f32 -1.0, %v3580_v21  ;;  %v610_v25 = vsel %vm590_vm1, %v543_v61, %v2799_v20  ;;  %v3395_v61 = vld [vmem:[%s4556_s5 + $0x30] sm:$0xff]   ;;  %v3400_v21 = vld [vmem:[%s4557_s6 + $0x8] ss:$16 sps:$4 sm:$0xff]  }
 0x3f1   :  { %v2802_v26 = vadd.f32 -1.0, %v3582_v23  ;;  %v612_v27 = vsel %vm592_vm2, %v584_v62, %v2801_v22  ;;  %v615_v31 = vpack.c.bf16 %v610_v25, %v610_v25  ;;  %v3396_v62 = vld [vmem:[%s4556_s5 + $0x38] sm:$0xff]   ;;  %v3399_v20 = vld [vmem:[%s4557_s6 + $0x4] ss:$16 sps:$4 sm:$0xff]   ;;  %v3403_v23 = vld [vmem:[%s4557_s6 + $0x20] ss:$16 sps:$4 sm:$0xff]  }
 0x3f2   :  { %v611_v28 = vsel %vm591_vm3, %v545_v2, %v2800_v24  ;;  %v617_v33 = vpack.c.bf16 %v612_v27, %v612_v27  ;;  %v3402_v22 = vld [vmem:[%s4557_s6 + $0xc] ss:$16 sps:$4 sm:$0xff]   ;;  %1333 = vmatprep.subr.bf16.mxu1 %v3399_v20  ;;  %v3405_v24 = vld [vmem:[%s4557_s6 + $0x24] ss:$16 sps:$4 sm:$0xff]   ;;  %v3406_v25 = vld [vmem:[%s4557_s6 + $0x28] ss:$16 sps:$4 sm:$0xff]  }
 0x3f3   :  { %v616_v29 = vpack.c.bf16 %v611_v28, %v611_v28  ;;  %v613_v30 = vsel %vm593_vm4, %v586_v3, %v2802_v26  ;;  %v3408_v26 = vld [vmem:[%s4557_s6 + $0x2c] ss:$16 sps:$4 sm:$0xff]   ;;  %v3409_v27 = vld [vmem:[%s4557_s6 + $0x40] ss:$16 sps:$4 sm:$0xff]   ;;  %v3411_v28 = vld [vmem:[%s4557_s6 + $0x44] ss:$16 sps:$4 sm:$0xff]  }
 0x3f4   :  { %v618_v32 = vpack.c.bf16 %v613_v30, %v613_v30  ;;  %v3414_v30 = vld [vmem:[%s4557_s6 + $0x4c] ss:$16 sps:$4 sm:$0xff]  }
 0x3f5   :  { %911 = vmatprep.mubr.bf16.mxu0 %v616_v29  ;;  %v3412_v29 = vld [vmem:[%s4557_s6 + $0x48] ss:$16 sps:$4 sm:$0xff]  }
 0x3f6   :  { %951 = vmatprep.mubr.bf16.mxu1 %v618_v32  ;;  %912 = vmatmul.mubr.bf16.vlgmr.msra.gmra.mrb[8].mxu0 %v615_v31  ;;  %v3458_v20 = vld [vmem:[%s4558_s7 + $0xd8] sm:$0xff]  }
 0x3f7   :  { %952 = vmatmul.mubr.bf16.vlgmr.msra.gmra.mrb[8].mxu1 %v617_v33  ;;  %3246 = vmatprep.mubr.msk.bf16.mxu0 %vm3610_vm0, %v3609_v0 }
 0x3f8   :  { %1365 = vmatprep.mubr.bf16.mxu1 %v3611_v5  ;;  %3231 = vmatpush3.bf16.msra.mxu0 %v3389_v48  ;;  %v3438_v48 = vld [vmem:[%s4557_s6 + $0xcc] ss:$16 sps:$4 sm:$0xff]  }
 0x3f9   :  { %3232 = vmatprep.subr.bf16.mxu0 %v3609_v0  ;;  %1334 = vmatpush1.bf16.msra.mxu1 %v3397_v19  ;;  %v3457_v19 = vld [vmem:[%s4558_s7 + $0x58] sm:$0xff]  }
 0x3fa   :  { %1335 = vmatprep.subr.bf16.mxu1 %v3405_v24  ;;  %v3462_v24 = vld [vmem:[%s4558_s7 + $0xe0] sm:$0xff]  }
 0x3fc   :  { %3233 = vmatpush3.bf16.msra.mxu0 %v3390_v49  ;;  %v3433_v49 = vld [vmem:[%s4557_s6 + $0xc0] ss:$16 sps:$4 sm:$0xff]  }
 0x3fd   :  { %3234 = vmatprep.subr.bf16.mxu0 %v3609_v0  ;;  %1336 = vmatpush1.bf16.msra.mxu1 %v3403_v23  ;;  %v3461_v23 = vld [vmem:[%s4558_s7 + $0x60] sm:$0xff]  }
 0x3fe   :  { %1337 = vmatprep.subr.bf16.mxu1 %v3411_v28  ;;  %v3466_v28 = vld [vmem:[%s4558_s7 + $0xe8] sm:$0xff]  }
 0x401   :  { %1338 = vmatpush1.bf16.msra.mxu1 %v3409_v27  ;;  %v3465_v27 = vld [vmem:[%s4558_s7 + $0x68] sm:$0xff]  }
 0x4c9   :  { %v3047_v34 = vpop.f32.mrb[8].mxu0 }
 0x4ca   :  { %v3069_v35 = vpop.f32.mrb[8].mxu1  ;;  %v3048_v37 = vpop.f32.mrb[9].mxu0 }
 0x4cb   :  { %v3049_v38 = vadd.f32 %v3048_v37, %v3047_v34  ;;  %v3070_v39 = vpop.f32.mrb[9].mxu1  ;;  %v3050_v40 = vpop.f32.mrb[10].mxu0  ;;  %v3415_v37 = vld [vmem:[%s4557_s6 + $0x60] ss:$16 sps:$4 sm:$0xff]  }
 0x4cc   :  { %v3071_v41 = vadd.f32 %v3070_v39, %v3069_v35  ;;  %v3072_v42 = vpop.f32.mrb[10].mxu1  ;;  %v3051_v43 = vpop.f32.mrb[11].mxu0  ;;  %v3417_v35 = vld [vmem:[%s4557_s6 + $0x64] ss:$16 sps:$4 sm:$0xff]   ;;  %v3426_v40 = vld [vmem:[%s4557_s6 + $0x8c] ss:$16 sps:$4 sm:$0xff]  }
 0x4cd   :  { %v914_v44 = vadd.f32 %v3049_v38, %v2803_v36  ;;  %v3073_v45 = vpop.f32.mrb[11].mxu1  ;;  %v3420_v36 = vld [vmem:[%s4557_s6 + $0x6c] ss:$16 sps:$4 sm:$0xff]   ;;  %v3418_v38 = vld [vmem:[%s4557_s6 + $0x68] ss:$16 sps:$4 sm:$0xff]   ;;  %1339 = vmatprep.subr.bf16.mxu1 %v3417_v35 }
 0x4ce   :  { %1340 = vmatpush1.bf16.msra.mxu1 %v3415_v37  ;;  %v3423_v39 = vld [vmem:[%s4557_s6 + $0x84] ss:$16 sps:$4 sm:$0xff]   ;;  %v3424_v42 = vld [vmem:[%s4557_s6 + $0x88] ss:$16 sps:$4 sm:$0xff]   ;;  %v3427_v45 = vld [vmem:[%s4557_s6 + $0xa0] ss:$16 sps:$4 sm:$0xff]  }
 0x4cf   :  { %v954_v46 = vadd.f32 %v3071_v41, %v914_v44  ;;  %v3421_v41 = vld [vmem:[%s4557_s6 + $0x80] ss:$16 sps:$4 sm:$0xff]   ;;  %1341 = vmatprep.subr.bf16.mxu1 %v3423_v39  ;;  %v3429_v43 = vld [vmem:[%s4557_s6 + $0xa4] ss:$16 sps:$4 sm:$0xff]   ;;  %v3432_v44 = vld [vmem:[%s4557_s6 + $0xac] ss:$16 sps:$4 sm:$0xff]  }
 0x4d0   :  { %v3473_v35 = vld [vmem:[%s4558_s7 + $0x78] sm:$0xff]  }
 0x4d1   :  { %v959_v47 = vadd.f32 %v954_v46, %v3874_v16  ;;  %v3391_v16 = vld [vmem:[%s4556_s5 + $0x10] sm:$0xff]   ;;  %v3430_v46 = vld [vmem:[%s4557_s6 + $0xa8] ss:$16 sps:$4 sm:$0xff]  }
 0x4d2   :  { %3235 = vmatpush3.bf16.msra.mxu0 %v3391_v16  ;;  %1342 = vmatpush1.bf16.msra.mxu1 %v3421_v41  ;;  %v3442_v16 = vld [vmem:[%s4557_s6 + $0xe8] ss:$16 sps:$4 sm:$0xff]  }
 0x4d3   :  { %960 = vadd.xlane.f32.xlu1 %v959_v47  ;;  %3236 = vmatprep.subr.bf16.mxu0 %v3609_v0  ;;  %v3475_v37 = vld [vmem:[%s4558_s7 + $0x38] sm:$0xff]  }
 0x4d4   :  { %1343 = vmatprep.subr.bf16.mxu1 %v3429_v43  ;;  %v2849_v39 = vld [vmem:[%s4555_s13 + $0x1] ss:$8 sm:$0xf] }
 0x4d5   :  { %v1164_v41 = vrot.slane %v2849_v39, %v3971_v51  ;;  %v1168_v43 = vrot.slane %v2849_v39, %v3978_v54 }
 0x4d6   :  { %3237 = vmatpush3.bf16.msra.mxu0 %v3392_v58  ;;  %1344 = vmatpush1.bf16.msra.mxu1 %v3427_v45  ;;  %v3445_v58 = vld [vmem:[%s4558_s7 + $0x40] sm:$0xff]  }
 0x4d7   :  { %3238 = vmatprep.subr.bf16.mxu0 %v3609_v0 }
 0x4da   :  { %3239 = vmatpush3.bf16.msra.mxu0 %v3393_v59  ;;  %v3446_v59 = vld [vmem:[%s4558_s7 + $0xc0] sm:$0xff]  }
 0x4db   :  { %3240 = vmatprep.subr.bf16.mxu0 %v3609_v0 }
 0x4de   :  { %3241 = vmatpush3.bf16.msra.mxu0 %v3394_v60 }
 0x4df   :  { %3242 = vmatprep.subr.bf16.mxu0 %v3609_v0 }
 0x4e2   :  { %3243 = vmatpush3.bf16.msra.mxu0 %v3395_v61 }
 0x4e3   :  { %3244 = vmatprep.subr.bf16.mxu0 %v3609_v0 }
 0x4e6   :  { %3245 = vmatpush3.bf16.msra.mxu0 %v3396_v62 }
 0x4e7   :  { %1374 = vmatprep.subr.bf16.mxu0 %v3402_v22  ;;  %v3460_v22 = vld [vmem:[%s4558_s7 + $0x98] sm:$0xff]  }
 0x560   :  { %v961_v52 = vpop.xlane.xlu1 %960 }
 0x561   :  { %v962_v55 = vmul.f32 0.0078125, %v961_v52  ;;  %v3436_v52 = vld [vmem:[%s4557_s6 + $0xc8] ss:$16 sps:$4 sm:$0xff]  }
 0x563   :  { %v963_v56 = vsub.f32 %v959_v47, %v962_v55  ;;  %v3435_v47 = vld [vmem:[%s4557_s6 + $0xc4] ss:$16 sps:$4 sm:$0xff]  }
 0x564   :  { %1345 = vmatprep.subr.bf16.mxu1 %v3435_v47  ;;  %v3441_v55 = vld [vmem:[%s4557_s6 + $0xe4] ss:$16 sps:$4 sm:$0xff]  }
 0x565   :  { %v964_v57 = vmul.f32 %v963_v56, %v963_v56  ;;  %1346 = vmatpush1.bf16.msra.mxu1 %v3433_v49 }
 0x566   :  { %1347 = vmatprep.subr.bf16.mxu1 %v3441_v55 }
 0x567   :  { %965 = vadd.xlane.f32.xlu1 %v964_v57  ;;  %v3439_v57 = vld [vmem:[%s4557_s6 + $0xe0] ss:$16 sps:$4 sm:$0xff]  }
 0x569   :  { %1348 = vmatpush1.bf16.msra.mxu1 %v3439_v57 }
 0x56a   :  { %3084 = vmatprep.subr.bf16.mxu1 %v3445_v58 }
 0x5f4   :  { %v966_v63 = vpop.xlane.xlu1 %965 }
 0x5f5   :  { %v967_v1 = vmul.f32 0.0078125, %v966_v63 }
 0x5f7   :  { %v968_v2 = vadd.f32 1e-05, %v967_v1  ;;  %v2847_v1 = vld [vmem:[%s4552_s12 + $0x8] ss:$0 sm:$0xff] }
 0x5f9   :  { %3583 = vrsqrt.f32 %v968_v2 }
 0x603   :  { %v3584_v3 = vpop.eup %3583 }
 0x604   :  { %v970_v6 = vmul.f32 %v3584_v3, %v963_v56  ;;  %v3444_v56 = vld [vmem:[%s4557_s6 + $0xec] ss:$16 sps:$4 sm:$0xff]   ;;  %v2848_v3 = vld [vmem:[%s4552_s12 + $0x9] ss:$0 sm:$0xff] }
 0x606   :  { %v976_v8 = vmul.f32 %v2836_v4, %v970_v6 }
 0x608   :  { %v982_v9 = vadd.f32 %v2837_v7, %v976_v8  ;;  %v3447_v7 = vld [vmem:[%s4558_s7] sm:$0xff]  }
 0x609   :  { %v3448_v8 = vld [vmem:[%s4558_s7 + $0x80] sm:$0xff]  }
 0x60a   :  { %v984_v10 = vpack.c.bf16 %v982_v9, %v982_v9 }
 0x60c   :  { %3247 = vmatmul.mubr.bf16.vlgmr.msra.gmra.mrb[12].mxu0 %v984_v10  ;;  %v3449_v10 = vld [vmem:[%s4558_s7 + $0x48] sm:$0xff]  }
 0x60d   :  { %1406 = vmatprep.mubr.bf16.mxu0 %v3611_v5  ;;  %1375 = vmatpush1.bf16.msra.mxu0 %v3400_v21  ;;  %v3459_v21 = vld [vmem:[%s4558_s7 + $0x18] sm:$0xff]  }
 0x60e   :  { %1376 = vmatprep.subr.bf16.mxu0 %v3408_v26  ;;  %v3464_v26 = vld [vmem:[%s4558_s7 + $0xa0] sm:$0xff]  }
 0x611   :  { %1377 = vmatpush1.bf16.msra.mxu0 %v3406_v25  ;;  %v3463_v25 = vld [vmem:[%s4558_s7 + $0x20] sm:$0xff]  }
 0x612   :  { %1378 = vmatprep.subr.bf16.mxu0 %v3414_v30  ;;  %v3468_v30 = vld [vmem:[%s4558_s7 + $0xa8] sm:$0xff]  }
 0x615   :  { %1379 = vmatpush1.bf16.msra.mxu0 %v3412_v29  ;;  %v3467_v29 = vld [vmem:[%s4558_s7 + $0x28] sm:$0xff]  }
 0x616   :  { %1380 = vmatprep.subr.bf16.mxu0 %v3420_v36  ;;  %v3474_v36 = vld [vmem:[%s4558_s7 + $0xf8] sm:$0xff]  }
 0x619   :  { %1381 = vmatpush1.bf16.msra.mxu0 %v3418_v38  ;;  %v3476_v38 = vld [vmem:[%s4558_s7 + $0xb8] sm:$0xff]  }
 0x61a   :  { %1382 = vmatprep.subr.bf16.mxu0 %v3426_v40  ;;  %v1156_v40 = vrot.slane %v2849_v39, %v3969_v50 }
 0x61d   :  { %1383 = vmatpush1.bf16.msra.mxu0 %v3424_v42  ;;  %v1160_v42 = vrot.slane %v2849_v39, %v3976_v53 }
 0x61e   :  { %1384 = vmatprep.subr.bf16.mxu0 %v3432_v44 }
 0x621   :  { %1385 = vmatpush1.bf16.msra.mxu0 %v3430_v46 }
 0x622   :  { %1386 = vmatprep.subr.bf16.mxu0 %v3438_v48 }
 0x625   :  { %1387 = vmatpush1.bf16.msra.mxu0 %v3436_v52 }
 0x626   :  { %1388 = vmatprep.subr.bf16.mxu0 %v3444_v56 }
 0x629   :  { %1389 = vmatpush1.bf16.msra.mxu0 %v3442_v16 }
 0x62a   :  { %3106 = vmatprep.subr.bf16.mxu0 %v3446_v59 }
 0x6df   :  { %v1087_v12 = vpop.f32.mrb[12].mxu0 }
 0x6e0   :  { %v1088_v13 = vadd.f32 %v2838_v11, %v1087_v12  ;;  %v3248_v14 = vpop.f32.mrb[13].mxu0  ;;  %v3450_v11 = vld [vmem:[%s4558_s7 + $0xc8] sm:$0xff]  }
 0x6e1   :  { %v1090_v15 = vpop.f32.mrb[14].mxu0  ;;  %v3451_v12 = vld [vmem:[%s4558_s7 + $0x8] sm:$0xff]   ;;  %v3453_v14 = vld [vmem:[%s4558_s7 + $0x50] sm:$0xff]  }
 0x6e2   :  { %v3249_v17 = vpop.f32.mrb[15].mxu0  ;;  %v1093_v18 = vadd.f32 %v1088_v13, %v982_v9  ;;  %v3452_v13 = vld [vmem:[%s4558_s7 + $0x88] sm:$0xff]   ;;  %v3454_v15 = vld [vmem:[%s4558_s7 + $0xd0] sm:$0xff]  }
 0x6e3   :  { %v3455_v17 = vld [vmem:[%s4558_s7 + $0x10] sm:$0xff]  }
 0x6e4   :  { %1094 = vadd.xlane.f32.xlu0 %v1093_v18 }
 0x771   :  { %v1095_v31 = vpop.xlane.xlu0 %1094 }
 0x772   :  { %v1096_v32 = vmul.f32 0.0078125, %v1095_v31  ;;  %v3469_v31 = vld [vmem:[%s4558_s7 + $0x70] sm:$0xff]  }
 0x774   :  { %v1097_v33 = vsub.f32 %v1093_v18, %v1096_v32  ;;  %v3456_v18 = vld [vmem:[%s4558_s7 + $0x90] sm:$0xff]  }
 0x775   :  { %v3470_v32 = vld [vmem:[%s4558_s7 + $0xf0] sm:$0xff]  }
 0x776   :  { %v1098_v34 = vmul.f32 %v1097_v33, %v1097_v33 }
 0x778   :  { %1099 = vadd.xlane.f32.xlu1 %v1098_v34  ;;  %v3472_v34 = vld [vmem:[%s4558_s7 + $0xb0] sm:$0xff]  }
 0x805   :  { %v1100_v60 = vpop.xlane.xlu1 %1099 }
 0x806   :  { %v1101_v61 = vmul.f32 0.0078125, %v1100_v60 }
 0x808   :  { %v1102_v62 = vadd.f32 1e-05, %v1101_v61 }
 0x80a   :  { %3585 = vrsqrt.f32 %v1102_v62 }
 0x814   :  { %v3586_v63 = vpop.eup %3585 }
 0x815   :  { %v1104_v2 = vmul.f32 %v3586_v63, %v1097_v33  ;;  %v3471_v33 = vld [vmem:[%s4558_s7 + $0x30] sm:$0xff]  }
 0x817   :  { %v1110_v4 = vmul.f32 %v2847_v1, %v1104_v2 }
 0x819   :  { %v4140_v6 = vadd.f32 %v2848_v3, %v1110_v4 }
 0x81b   :  { %v1119_v9 = vpack.c.bf16 %v4140_v6, %v4140_v6 }
 0x81d   :  { %1366 = vmatmul.mubr.bf16.vlgmr.msra.gmra.mrb[12].mxu1 %v1119_v9  ;;  %1407 = vmatmul.mubr.bf16.vlgmr.msra.gmra.mrb[16].mxu0 %v1119_v9 }
 0x81e   :  { %3085 = vmatpush3.bf16.msra.mxu1 %v3447_v7  ;;  %3107 = vmatpush3.bf16.msra.mxu0 %v3448_v8 }
 0x81f   :  { %3086 = vmatprep.subr.bf16.mxu1 %v3449_v10  ;;  %3108 = vmatprep.subr.bf16.mxu0 %v3450_v11 }
 0x822   :  { %3087 = vmatpush3.bf16.msra.mxu1 %v3451_v12  ;;  %3109 = vmatpush3.bf16.msra.mxu0 %v3452_v13 }
 0x823   :  { %3088 = vmatprep.subr.bf16.mxu1 %v3453_v14  ;;  %3110 = vmatprep.subr.bf16.mxu0 %v3454_v15 }
 0x826   :  { %3089 = vmatpush3.bf16.msra.mxu1 %v3455_v17  ;;  %3111 = vmatpush3.bf16.msra.mxu0 %v3456_v18 }
 0x827   :  { %3090 = vmatprep.subr.bf16.mxu1 %v3457_v19  ;;  %3112 = vmatprep.subr.bf16.mxu0 %v3458_v20 }
 0x82a   :  { %3091 = vmatpush3.bf16.msra.mxu1 %v3459_v21  ;;  %3113 = vmatpush3.bf16.msra.mxu0 %v3460_v22 }
 0x82b   :  { %3092 = vmatprep.subr.bf16.mxu1 %v3461_v23  ;;  %3114 = vmatprep.subr.bf16.mxu0 %v3462_v24 }
 0x82e   :  { %3093 = vmatpush3.bf16.msra.mxu1 %v3463_v25  ;;  %3115 = vmatpush3.bf16.msra.mxu0 %v3464_v26  ;;  %v2886_v25 = vld [vmem:[%s4552_s12 + $0xa] ss:$0 sm:$0xff] }
 0x82f   :  { %3094 = vmatprep.subr.bf16.mxu1 %v3465_v27  ;;  %3116 = vmatprep.subr.bf16.mxu0 %v3466_v28 }
 0x832   :  { %3095 = vmatpush3.bf16.msra.mxu1 %v3467_v29  ;;  %3117 = vmatpush3.bf16.msra.mxu0 %v3468_v30 }
 0x833   :  { %3096 = vmatprep.subr.bf16.mxu1 %v3469_v31  ;;  %3118 = vmatprep.subr.bf16.mxu0 %v3470_v32 }
 0x836   :  { %3097 = vmatpush3.bf16.msra.mxu1 %v3471_v33  ;;  %3119 = vmatpush3.bf16.msra.mxu0 %v3472_v34 }
 0x837   :  { %3098 = vmatprep.subr.bf16.mxu1 %v3473_v35  ;;  %3120 = vmatprep.subr.bf16.mxu0 %v3474_v36 }
 0x83a   :  { %3099 = vmatpush3.bf16.msra.mxu1 %v3475_v37  ;;  %3121 = vmatpush3.bf16.msra.mxu0 %v3476_v38  ;;  %v3477_v37 = vld [vmem:[%s4559_s8] sm:$0xff]   ;;  %v3478_v38 = vld [vmem:[%s4559_s8 + $0x8] sm:$0xff]  }
 0x83b   :  { %3250 = vmatprep.subr.bf16.mxu1 %v3609_v0 }
 0x8f0   :  { %v1367_v44 = vpop.f32.mrb[12].mxu1  ;;  %v1408_v45 = vpop.f32.mrb[16].mxu0 }
 0x8f1   :  { %v1368_v46 = vadd.f32 %v1367_v44, %v1156_v40  ;;  %v1409_v47 = vadd.f32 %v1408_v45, %v1164_v41  ;;  %v1369_v48 = vpop.f32.mrb[13].mxu1  ;;  %v1410_v49 = vpop.f32.mrb[17].mxu0  ;;  %v3481_v44 = vld [vmem:[%s4559_s8 + $0x20] sm:$0xff]   ;;  %v3482_v45 = vld [vmem:[%s4559_s8 + $0x28] sm:$0xff]  }
 0x8f2   :  { %v1370_v52 = vadd.f32 %v1369_v48, %v1160_v42  ;;  %v1411_v55 = vadd.f32 %v1410_v49, %v1168_v43  ;;  %v1371_v56 = vpop.f32.mrb[14].mxu1  ;;  %v1412_v57 = vpop.f32.mrb[18].mxu0  ;;  %v3480_v43 = vld [vmem:[%s4559_s8 + $0x18] sm:$0xff]  }
 0x8f3   :  { %v1419_v16 = vmin.f32 %v1368_v46, 0.0  ;;  %v1421_v58 = vmin.f32 %v1409_v47, 0.0  ;;  %v1372_v59 = vpop.f32.mrb[15].mxu1  ;;  %v1413_v60 = vpop.f32.mrb[19].mxu0  ;;  %vm1415_vm5 = vcmp.gt.f32.partialorder %v1368_v46, 0.0  ;;  %vm1417_vm6 = vcmp.gt.f32.partialorder %v1409_v47, 0.0 }
 0x8f4   :  { %v1420_v61 = vmin.f32 %v1370_v52, 0.0  ;;  %v1422_v62 = vmin.f32 %v1411_v55, 0.0  ;;  %vm1416_vm7 = vcmp.gt.f32.partialorder %v1370_v52, 0.0  ;;  %vm1418_vm8 = vcmp.gt.f32.partialorder %v1411_v55, 0.0  ;;  %v2919_v56 = vld [vmem:[%s4552_s12 + $0xb] ss:$0 sm:$0xff] }
 0x8f5   :  { %v1423_v63 = vmul.f32 1.442695, %v1419_v16  ;;  %v1427_v1 = vmul.f32 1.442695, %v1421_v58  ;;  %v2920_v16 = vld [vmem:[%s4552_s12 + $0xc] ss:$0 sm:$0xff] }
 0x8f6   :  { %v1425_v2 = vmul.f32 1.442695, %v1420_v61  ;;  %v1429_v3 = vmul.f32 1.442695, %v1422_v62  ;;  %v2921_v61 = vld [vmem:[%s4552_s12 + $0xd] ss:$0 sm:$0xff] }
 0x8f7   :  { %3587 = vpow2.f32 %v1423_v63 }
 0x8f8   :  { %3589 = vpow2.f32 %v1427_v1 }
 0x8f9   :  { %3591 = vpow2.f32 %v1425_v2 }
 0x8fa   :  { %3593 = vpow2.f32 %v1429_v3 }
 0x901   :  { %v3588_v4 = vpop.eup %3587 }
 0x902   :  { %v3590_v7 = vpop.eup %3589  ;;  %v2882_v8 = vadd.f32 -1.0, %v3588_v4  ;;  %v3485_v4 = vld [vmem:[%s4560_s9] ss:$16 sps:$4 sm:$0xff]  }
 0x903   :  { %v3592_v9 = vpop.eup %3591  ;;  %v2884_v10 = vadd.f32 -1.0, %v3590_v7  ;;  %v3487_v7 = vld [vmem:[%s4560_s9 + $0x4] ss:$16 sps:$4 sm:$0xff]  }
 0x904   :  { %v3594_v11 = vpop.eup %3593  ;;  %v2883_v12 = vadd.f32 -1.0, %v3592_v9  ;;  %v1435_v13 = vsel %vm1415_vm5, %v1368_v46, %v2882_v8  ;;  %v3483_v46 = vld [vmem:[%s4559_s8 + $0x30] sm:$0xff]   ;;  %v3490_v8 = vld [vmem:[%s4560_s9 + $0xc] ss:$16 sps:$4 sm:$0xff]   ;;  %2157 = vmatprep.subr.bf16.mxu0 %v3487_v7 }
 0x905   :  { %v2885_v14 = vadd.f32 -1.0, %v3594_v11  ;;  %v1437_v15 = vsel %vm1417_vm6, %v1409_v47, %v2884_v10  ;;  %v1440_v20 = vpack.c.bf16 %v1435_v13, %v1435_v13  ;;  %v3484_v47 = vld [vmem:[%s4559_s8 + $0x38] sm:$0xff]   ;;  %v3491_v9 = vld [vmem:[%s4560_s9 + $0x20] ss:$16 sps:$4 sm:$0xff]   ;;  %v3493_v10 = vld [vmem:[%s4560_s9 + $0x24] ss:$16 sps:$4 sm:$0xff]  }
 0x906   :  { %v1436_v17 = vsel %vm1416_vm7, %v1370_v52, %v2883_v12  ;;  %v1442_v22 = vpack.c.bf16 %v1437_v15, %v1437_v15  ;;  %v3494_v11 = vld [vmem:[%s4560_s9 + $0x28] ss:$16 sps:$4 sm:$0xff]   ;;  %v3496_v12 = vld [vmem:[%s4560_s9 + $0x2c] ss:$16 sps:$4 sm:$0xff]   ;;  %v3497_v13 = vld [vmem:[%s4560_s9 + $0x40] ss:$16 sps:$4 sm:$0xff]  }
 0x907   :  { %v1441_v18 = vpack.c.bf16 %v1436_v17, %v1436_v17  ;;  %v1438_v19 = vsel %vm1418_vm8, %v1411_v55, %v2885_v14  ;;  %v3499_v14 = vld [vmem:[%s4560_s9 + $0x44] ss:$16 sps:$4 sm:$0xff]   ;;  %v3500_v15 = vld [vmem:[%s4560_s9 + $0x48] ss:$16 sps:$4 sm:$0xff]   ;;  %v3502_v17 = vld [vmem:[%s4560_s9 + $0x4c] ss:$16 sps:$4 sm:$0xff]  }
 0x908   :  { %v1443_v21 = vpack.c.bf16 %v1438_v19, %v1438_v19  ;;  %v3547_v7 = vld [vmem:[%s4561_s10 + $0x18] sm:$0xff]  }
 0x909   :  { %1736 = vmatprep.mubr.bf16.mxu1 %v1441_v18 }
 0x90a   :  { %1776 = vmatprep.mubr.bf16.mxu0 %v1443_v21  ;;  %1737 = vmatmul.mubr.bf16.vlgmr.msra.gmra.mrb[16].mxu1 %v1440_v20 }
 0x90b   :  { %1777 = vmatmul.mubr.bf16.vlgmr.msra.gmra.mrb[20].mxu0 %v1442_v22  ;;  %3266 = vmatprep.mubr.msk.bf16.mxu1 %vm3610_vm0, %v3609_v0  ;;  %v3505_v22 = vld [vmem:[%s4560_s9 + $0x64] ss:$16 sps:$4 sm:$0xff]  }
 0x90c   :  { %2189 = vmatprep.mubr.bf16.mxu0 %v3611_v5  ;;  %3251 = vmatpush3.bf16.msra.mxu1 %v3477_v37  ;;  %v3524_v37 = vld [vmem:[%s4560_s9 + $0xc8] ss:$16 sps:$4 sm:$0xff]  }
 0x90d   :  { %3252 = vmatprep.subr.bf16.mxu1 %v3609_v0  ;;  %2158 = vmatpush1.bf16.msra.mxu0 %v3485_v4  ;;  %v3546_v4 = vld [vmem:[%s4561_s10 + $0xd8] sm:$0xff]  }
 0x90e   :  { %2159 = vmatprep.subr.bf16.mxu0 %v3493_v10  ;;  %v3551_v10 = vld [vmem:[%s4561_s10 + $0x20] sm:$0xff]  }
 0x910   :  { %3253 = vmatpush3.bf16.msra.mxu1 %v3478_v38  ;;  %v3529_v38 = vld [vmem:[%s4560_s9 + $0xe4] ss:$16 sps:$4 sm:$0xff]  }
 0x911   :  { %3254 = vmatprep.subr.bf16.mxu1 %v3609_v0  ;;  %2160 = vmatpush1.bf16.msra.mxu0 %v3491_v9  ;;  %v3550_v9 = vld [vmem:[%s4561_s10 + $0xe0] sm:$0xff]  }
 0x912   :  { %2161 = vmatprep.subr.bf16.mxu0 %v3499_v14  ;;  %v3555_v14 = vld [vmem:[%s4561_s10 + $0x28] sm:$0xff]  }
 0x915   :  { %2162 = vmatpush1.bf16.msra.mxu0 %v3497_v13  ;;  %v3554_v13 = vld [vmem:[%s4561_s10 + $0xe8] sm:$0xff]  }
 0x916   :  { %2163 = vmatprep.subr.bf16.mxu0 %v3505_v22  ;;  %v3562_v22 = vld [vmem:[%s4561_s10 + $0xf8] sm:$0xff]  }
 0x9dd   :  { %v3100_v23 = vpop.f32.mrb[16].mxu1 }
 0x9de   :  { %v3122_v24 = vpop.f32.mrb[20].mxu0  ;;  %v3101_v26 = vpop.f32.mrb[17].mxu1 }
 0x9df   :  { %v3102_v27 = vadd.f32 %v3101_v26, %v3100_v23  ;;  %v3123_v28 = vpop.f32.mrb[21].mxu0  ;;  %v3103_v29 = vpop.f32.mrb[18].mxu1  ;;  %v3508_v23 = vld [vmem:[%s4560_s9 + $0x6c] ss:$16 sps:$4 sm:$0xff]   ;;  %v3511_v26 = vld [vmem:[%s4560_s9 + $0x84] ss:$16 sps:$4 sm:$0xff]  }
 0x9e0   :  { %v3124_v30 = vadd.f32 %v3123_v28, %v3122_v24  ;;  %v3125_v31 = vpop.f32.mrb[22].mxu0  ;;  %v3104_v32 = vpop.f32.mrb[19].mxu1  ;;  %v3503_v24 = vld [vmem:[%s4560_s9 + $0x60] ss:$16 sps:$4 sm:$0xff]   ;;  %v3512_v29 = vld [vmem:[%s4560_s9 + $0x88] ss:$16 sps:$4 sm:$0xff]  }
 0x9e1   :  { %v1739_v33 = vadd.f32 %v3102_v27, %v2886_v25  ;;  %v3126_v34 = vpop.f32.mrb[23].mxu0  ;;  %v3506_v25 = vld [vmem:[%s4560_s9 + $0x68] ss:$16 sps:$4 sm:$0xff]   ;;  %2164 = vmatpush1.bf16.msra.mxu0 %v3503_v24  ;;  %v3514_v27 = vld [vmem:[%s4560_s9 + $0x8c] ss:$16 sps:$4 sm:$0xff]  }
 0x9e2   :  { %v3509_v28 = vld [vmem:[%s4560_s9 + $0x80] ss:$16 sps:$4 sm:$0xff]   ;;  %2165 = vmatprep.subr.bf16.mxu0 %v3511_v26  ;;  %v3520_v31 = vld [vmem:[%s4560_s9 + $0xac] ss:$16 sps:$4 sm:$0xff]   ;;  %v3523_v34 = vld [vmem:[%s4560_s9 + $0xc4] ss:$16 sps:$4 sm:$0xff]  }
 0x9e3   :  { %v1779_v35 = vadd.f32 %v3124_v30, %v1739_v33  ;;  %v3517_v30 = vld [vmem:[%s4560_s9 + $0xa4] ss:$16 sps:$4 sm:$0xff]   ;;  %v3515_v32 = vld [vmem:[%s4560_s9 + $0xa0] ss:$16 sps:$4 sm:$0xff]   ;;  %v3518_v33 = vld [vmem:[%s4560_s9 + $0xa8] ss:$16 sps:$4 sm:$0xff]  }
 0x9e4   :  { %v3564_v24 = vld [vmem:[%s4561_s10 + $0xb8] sm:$0xff]  }
 0x9e5   :  { %v1784_v36 = vadd.f32 %v1779_v35, %v4140_v6  ;;  %v3479_v6 = vld [vmem:[%s4559_s8 + $0x10] sm:$0xff]   ;;  %2166 = vmatpush1.bf16.msra.mxu0 %v3509_v28  ;;  %v3526_v35 = vld [vmem:[%s4560_s9 + $0xcc] ss:$16 sps:$4 sm:$0xff]  }
 0x9e6   :  { %3255 = vmatpush3.bf16.msra.mxu1 %v3479_v6  ;;  %2167 = vmatprep.subr.bf16.mxu0 %v3517_v30  ;;  %v3534_v6 = vld [vmem:[%s4561_s10 + $0xc0] sm:$0xff]  }
 0x9e7   :  { %1785 = vadd.xlane.f32.xlu0 %v1784_v36  ;;  %3256 = vmatprep.subr.bf16.mxu1 %v3609_v0 }
 0x9e9   :  { %2168 = vmatpush1.bf16.msra.mxu0 %v3515_v32 }
 0x9ea   :  { %3257 = vmatpush3.bf16.msra.mxu1 %v3480_v43  ;;  %2169 = vmatprep.subr.bf16.mxu0 %v3523_v34 }
 0x9eb   :  { %3258 = vmatprep.subr.bf16.mxu1 %v3609_v0 }
 0x9ee   :  { %3259 = vmatpush3.bf16.msra.mxu1 %v3481_v44 }
 0x9ef   :  { %3260 = vmatprep.subr.bf16.mxu1 %v3609_v0 }
 0x9f2   :  { %3261 = vmatpush3.bf16.msra.mxu1 %v3482_v45 }
 0x9f3   :  { %3262 = vmatprep.subr.bf16.mxu1 %v3609_v0 }
 0x9f6   :  { %3263 = vmatpush3.bf16.msra.mxu1 %v3483_v46 }
 0x9f7   :  { %3264 = vmatprep.subr.bf16.mxu1 %v3609_v0 }
 0x9fa   :  { %3265 = vmatpush3.bf16.msra.mxu1 %v3484_v47  ;;  %v2930_v47 = vld [vmem:[%s4552_s12 + $0xe] ss:$0 sm:$0xff] }
 0x9fb   :  { %2198 = vmatprep.subr.bf16.mxu1 %v3490_v8  ;;  %v3549_v8 = vld [vmem:[%s4561_s10 + $0x60] sm:$0xff]  }
 0xa74   :  { %v1786_v39 = vpop.xlane.xlu0 %1785 }
 0xa75   :  { %v1787_v40 = vmul.f32 0.0078125, %v1786_v39  ;;  %v3532_v39 = vld [vmem:[%s4560_s9 + $0xec] ss:$16 sps:$4 sm:$0xff]  }
 0xa77   :  { %v1788_v41 = vsub.f32 %v1784_v36, %v1787_v40  ;;  %v3521_v36 = vld [vmem:[%s4560_s9 + $0xc0] ss:$16 sps:$4 sm:$0xff]  }
 0xa78   :  { %2170 = vmatpush1.bf16.msra.mxu0 %v3521_v36  ;;  %v3527_v40 = vld [vmem:[%s4560_s9 + $0xe0] ss:$16 sps:$4 sm:$0xff]  }
 0xa79   :  { %v1789_v42 = vmul.f32 %v1788_v41, %v1788_v41  ;;  %2171 = vmatprep.subr.bf16.mxu0 %v3529_v38 }
 0xa7b   :  { %1790 = vadd.xlane.f32.xlu1 %v1789_v42  ;;  %v3533_v42 = vld [vmem:[%s4561_s10 + $0x40] sm:$0xff]  }
 0xa7c   :  { %2172 = vmatpush1.bf16.msra.mxu0 %v3527_v40 }
 0xa7d   :  { %3137 = vmatprep.subr.bf16.mxu0 %v3533_v42 }
 0xb08   :  { %v1791_v48 = vpop.xlane.xlu1 %1790 }
 0xb09   :  { %v1792_v49 = vmul.f32 0.0078125, %v1791_v48 }
 0xb0b   :  { %v1793_v52 = vadd.f32 1e-05, %v1792_v49  ;;  %v2931_v49 = vld [vmem:[%s4552_s12 + $0xf] ss:$0 sm:$0xff] }
 0xb0d   :  { %3595 = vrsqrt.f32 %v1793_v52 }
 0xb17   :  { %v3596_v55 = vpop.eup %3595 }
 0xb18   :  { %v1795_v57 = vmul.f32 %v3596_v55, %v1788_v41  ;;  %v3530_v41 = vld [vmem:[%s4560_s9 + $0xe8] ss:$16 sps:$4 sm:$0xff]  }
 0xb1a   :  { %v1801_v58 = vmul.f32 %v2919_v56, %v1795_v57  ;;  %v3535_v56 = vld [vmem:[%s4561_s10] sm:$0xff]  }
 0xb1b   :  { %v3536_v57 = vld [vmem:[%s4561_s10 + $0x80] sm:$0xff]  }
 0xb1c   :  { %v1807_v59 = vadd.f32 %v2920_v16, %v1801_v58  ;;  %v3537_v58 = vld [vmem:[%s4561_s10 + $0x48] sm:$0xff]  }
 0xb1e   :  { %v1809_v60 = vpack.c.bf16 %v1807_v59, %v1807_v59  ;;  %v3538_v59 = vld [vmem:[%s4561_s10 + $0xc8] sm:$0xff]  }
 0xb20   :  { %3267 = vmatmul.mubr.bf16.vlgmr.msra.gmra.mrb[20].mxu1 %v1809_v60  ;;  %v3539_v60 = vld [vmem:[%s4561_s10 + $0x8] sm:$0xff]  }
 0xb21   :  { %2230 = vmatprep.mubr.bf16.mxu1 %v3611_v5  ;;  %v3488_v5 = vld [vmem:[%s4560_s9 + $0x8] ss:$16 sps:$4 sm:$0xff]  }
 0xb22   :  { %2199 = vmatpush1.bf16.msra.mxu1 %v3488_v5  ;;  %v3548_v5 = vld [vmem:[%s4561_s10 + $0x98] sm:$0xff]  }
 0xb23   :  { %2200 = vmatprep.subr.bf16.mxu1 %v3496_v12  ;;  %v3553_v12 = vld [vmem:[%s4561_s10 + $0x68] sm:$0xff]  }
 0xb26   :  { %2201 = vmatpush1.bf16.msra.mxu1 %v3494_v11  ;;  %v3552_v11 = vld [vmem:[%s4561_s10 + $0xa0] sm:$0xff]  }
 0xb27   :  { %2202 = vmatprep.subr.bf16.mxu1 %v3502_v17  ;;  %v3557_v17 = vld [vmem:[%s4561_s10 + $0x70] sm:$0xff]  }
 0xb2a   :  { %2203 = vmatpush1.bf16.msra.mxu1 %v3500_v15  ;;  %v3556_v15 = vld [vmem:[%s4561_s10 + $0xa8] sm:$0xff]  }
 0xb2b   :  { %2204 = vmatprep.subr.bf16.mxu1 %v3508_v23  ;;  %v3563_v23 = vld [vmem:[%s4561_s10 + $0x38] sm:$0xff]  }
 0xb2e   :  { %2205 = vmatpush1.bf16.msra.mxu1 %v3506_v25  ;;  %v2932_v25 = vld [vmem:[%s4555_s13 + $0x2] ss:$8 sm:$0xf] }
 0xb2f   :  { %2206 = vmatprep.subr.bf16.mxu1 %v3514_v27  ;;  %v1980_v26 = vrot.slane %v2932_v25, %v3969_v50  ;;  %v1988_v27 = vrot.slane %v2932_v25, %v3971_v51  ;;  %v1984_v28 = vrot.slane %v2932_v25, %v3976_v53 }
 0xb32   :  { %2207 = vmatpush1.bf16.msra.mxu1 %v3512_v29  ;;  %v1992_v29 = vrot.slane %v2932_v25, %v3978_v54  ;;  %v3569_v25 = vld [vmem:[%s4562_s11 + $0x20] sm:$0xff]  }
 0xb33   :  { %2208 = vmatprep.subr.bf16.mxu1 %v3520_v31 }
 0xb36   :  { %2209 = vmatpush1.bf16.msra.mxu1 %v3518_v33 }
 0xb37   :  { %2210 = vmatprep.subr.bf16.mxu1 %v3526_v35 }
 0xb3a   :  { %2211 = vmatpush1.bf16.msra.mxu1 %v3524_v37 }
 0xb3b   :  { %2212 = vmatprep.subr.bf16.mxu1 %v3532_v39 }
 0xb3e   :  { %2213 = vmatpush1.bf16.msra.mxu1 %v3530_v41 }
 0xb3f   :  { %3159 = vmatprep.subr.bf16.mxu1 %v3534_v6 }
 0xbf3   :  { %v1912_v62 = vpop.f32.mrb[20].mxu1 }
 0xbf4   :  { %v1913_v63 = vadd.f32 %v2921_v61, %v1912_v62  ;;  %v3268_v1 = vpop.f32.mrb[21].mxu1  ;;  %v3540_v61 = vld [vmem:[%s4561_s10 + $0x88] sm:$0xff]   ;;  %v3541_v62 = vld [vmem:[%s4561_s10 + $0x50] sm:$0xff]  }
 0xbf5   :  { %v1915_v2 = vpop.f32.mrb[22].mxu1  ;;  %v3543_v1 = vld [vmem:[%s4561_s10 + $0x10] sm:$0xff]  }
 0xbf6   :  { %1918 = vadd.xlane.f32.xlu0 %v1913_v63  ;;  %v3269_v3 = vpop.f32.mrb[23].mxu1  ;;  %v3544_v2 = vld [vmem:[%s4561_s10 + $0x90] sm:$0xff]  }
 0xbf7   :  { %v3545_v3 = vld [vmem:[%s4561_s10 + $0x58] sm:$0xff]  }
 0xc83   :  { %v1919_v18 = vpop.xlane.xlu0 %1918 }
 0xc84   :  { %v1920_v19 = vmul.f32 0.0078125, %v1919_v18  ;;  %v3558_v18 = vld [vmem:[%s4561_s10 + $0xf0] sm:$0xff]  }
 0xc86   :  { %v1921_v20 = vsub.f32 %v1913_v63, %v1920_v19  ;;  %v3542_v63 = vld [vmem:[%s4561_s10 + $0xd0] sm:$0xff]  }
 0xc87   :  { %v3559_v19 = vld [vmem:[%s4561_s10 + $0x30] sm:$0xff]  }
 0xc88   :  { %v1922_v21 = vmul.f32 %v1921_v20, %v1921_v20 }
 0xc8a   :  { %1923 = vadd.xlane.f32.xlu1 %v1922_v21  ;;  %v3561_v21 = vld [vmem:[%s4561_s10 + $0x78] sm:$0xff]  }
 0xd17   :  { %v1924_v43 = vpop.xlane.xlu1 %1923 }
 0xd18   :  { %v1925_v44 = vmul.f32 0.0078125, %v1924_v43 }
 0xd1a   :  { %v1926_v45 = vadd.f32 1e-05, %v1925_v44 }
 0xd1c   :  { %3597 = vrsqrt.f32 %v1926_v45 }
 0xd26   :  { %v3598_v46 = vpop.eup %3597 }
 0xd27   :  { %v1928_v48 = vmul.f32 %v3598_v46, %v1921_v20  ;;  %v3560_v20 = vld [vmem:[%s4561_s10 + $0xb0] sm:$0xff]  }
 0xd29   :  { %v1934_v52 = vmul.f32 %v2930_v47, %v1928_v48 }
 0xd2b   :  { %v4398_v55 = vadd.f32 %v2931_v49, %v1934_v52 }
 0xd2d   :  { %v1943_v16 = vpack.c.bf16 %v4398_v55, %v4398_v55 }
 0xd2f   :  { %2190 = vmatmul.mubr.bf16.vlgmr.msra.gmra.mrb[24].mxu0 %v1943_v16  ;;  %2231 = vmatmul.mubr.bf16.vlgmr.msra.gmra.mrb[24].mxu1 %v1943_v16 }
 0xd30   :  { %3138 = vmatpush3.bf16.msra.mxu0 %v3535_v56  ;;  %3160 = vmatpush3.bf16.msra.mxu1 %v3536_v57 }
 0xd31   :  { %3139 = vmatprep.subr.bf16.mxu0 %v3537_v58  ;;  %3161 = vmatprep.subr.bf16.mxu1 %v3538_v59 }
 0xd34   :  { %3140 = vmatpush3.bf16.msra.mxu0 %v3539_v60  ;;  %3162 = vmatpush3.bf16.msra.mxu1 %v3540_v61 }
 0xd35   :  { %3141 = vmatprep.subr.bf16.mxu0 %v3541_v62  ;;  %3163 = vmatprep.subr.bf16.mxu1 %v3542_v63 }
 0xd38   :  { %3142 = vmatpush3.bf16.msra.mxu0 %v3543_v1  ;;  %3164 = vmatpush3.bf16.msra.mxu1 %v3544_v2 }
 0xd39   :  { %3143 = vmatprep.subr.bf16.mxu0 %v3545_v3  ;;  %3165 = vmatprep.subr.bf16.mxu1 %v3546_v4  ;;  %v2969_v4 = vld [vmem:[%s4552_s12 + $0x10] ss:$0 sm:$0xff] }
 0xd3c   :  { %3144 = vmatpush3.bf16.msra.mxu0 %v3547_v7  ;;  %3166 = vmatpush3.bf16.msra.mxu1 %v3548_v5 }
 0xd3d   :  { %3145 = vmatprep.subr.bf16.mxu0 %v3549_v8  ;;  %3167 = vmatprep.subr.bf16.mxu1 %v3550_v9 }
 0xd40   :  { %3146 = vmatpush3.bf16.msra.mxu0 %v3551_v10  ;;  %3168 = vmatpush3.bf16.msra.mxu1 %v3552_v11 }
 0xd41   :  { %3147 = vmatprep.subr.bf16.mxu0 %v3553_v12  ;;  %3169 = vmatprep.subr.bf16.mxu1 %v3554_v13 }
 0xd44   :  { %3148 = vmatpush3.bf16.msra.mxu0 %v3555_v14  ;;  %3170 = vmatpush3.bf16.msra.mxu1 %v3556_v15 }
 0xd45   :  { %3149 = vmatprep.subr.bf16.mxu0 %v3557_v17  ;;  %3171 = vmatprep.subr.bf16.mxu1 %v3558_v18  ;;  %v3565_v18 = vld [vmem:[%s4562_s11] sm:$0xff]  }
 0xd48   :  { %3150 = vmatpush3.bf16.msra.mxu0 %v3559_v19  ;;  %3172 = vmatpush3.bf16.msra.mxu1 %v3560_v20  ;;  %v3566_v19 = vld [vmem:[%s4562_s11 + $0x8] sm:$0xff]  }
 0xd49   :  { %3151 = vmatprep.subr.bf16.mxu0 %v3561_v21  ;;  %3173 = vmatprep.subr.bf16.mxu1 %v3562_v22 }
 0xd4c   :  { %3152 = vmatpush3.bf16.msra.mxu0 %v3563_v23  ;;  %3174 = vmatpush3.bf16.msra.mxu1 %v3564_v24  ;;  %v3568_v24 = vld [vmem:[%s4562_s11 + $0x18] sm:$0xff]  }
 0xd4d   :  { %3270 = vmatprep.subr.bf16.mxu0 %v3609_v0 }
 0xe02   :  { %v2191_v30 = vpop.f32.mrb[24].mxu0  ;;  %v2232_v31 = vpop.f32.mrb[24].mxu1 }
 0xe03   :  { %v2192_v32 = vadd.f32 %v2191_v30, %v1980_v26  ;;  %v2233_v33 = vadd.f32 %v2232_v31, %v1988_v27  ;;  %v2193_v34 = vpop.f32.mrb[25].mxu0  ;;  %v2234_v35 = vpop.f32.mrb[25].mxu1  ;;  %v3570_v26 = vld [vmem:[%s4562_s11 + $0x28] sm:$0xff]   ;;  %v3571_v27 = vld [vmem:[%s4562_s11 + $0x30] sm:$0xff]  }
 0xe04   :  { %v2194_v36 = vadd.f32 %v2193_v34, %v1984_v28  ;;  %v2235_v37 = vadd.f32 %v2234_v35, %v1992_v29  ;;  %v2195_v38 = vpop.f32.mrb[26].mxu0  ;;  %v2236_v39 = vpop.f32.mrb[26].mxu1  ;;  %v3572_v28 = vld [vmem:[%s4562_s11 + $0x38] sm:$0xff]   ;;  %v3003_v35 = vld [vmem:[%s4552_s12 + $0x12] ss:$0 sm:$0xff] }
 0xe05   :  { %v2243_v40 = vmin.f32 %v2192_v32, 0.0  ;;  %v2245_v41 = vmin.f32 %v2233_v33, 0.0  ;;  %v2196_v42 = vpop.f32.mrb[27].mxu0  ;;  %v2237_v50 = vpop.f32.mrb[27].mxu1  ;;  %vm2239_vm9 = vcmp.gt.f32.partialorder %v2192_v32, 0.0  ;;  %vm2241_vm10 = vcmp.gt.f32.partialorder %v2233_v33, 0.0 }
 0xe06   :  { %v2244_v6 = vmin.f32 %v2194_v36, 0.0  ;;  %v2246_v51 = vmin.f32 %v2235_v37, 0.0  ;;  %vm2240_vm11 = vcmp.gt.f32.partialorder %v2194_v36, 0.0  ;;  %vm2242_vm12 = vcmp.gt.f32.partialorder %v2235_v37, 0.0 }
 0xe07   :  { %v2247_v43 = vmul.f32 1.442695, %v2243_v40  ;;  %v2251_v53 = vmul.f32 1.442695, %v2245_v41 }
 0xe08   :  { %v2249_v44 = vmul.f32 1.442695, %v2244_v6  ;;  %v2253_v54 = vmul.f32 1.442695, %v2246_v51 }
 0xe09   :  { %3599 = vpow2.f32 %v2247_v43 }
 0xe0a   :  { %3601 = vpow2.f32 %v2251_v53 }
 0xe0b   :  { %3603 = vpow2.f32 %v2249_v44 }
 0xe0c   :  { %3605 = vpow2.f32 %v2253_v54 }
 0xe13   :  { %v3600_v45 = vpop.eup %3599 }
 0xe14   :  { %v3602_v46 = vpop.eup %3601  ;;  %v2965_v47 = vadd.f32 -1.0, %v3600_v45 }
 0xe15   :  { %v3604_v48 = vpop.eup %3603  ;;  %v2967_v49 = vadd.f32 -1.0, %v3602_v46 }
 0xe16   :  { %v3606_v52 = vpop.eup %3605  ;;  %v2966_v56 = vadd.f32 -1.0, %v3604_v48  ;;  %v2259_v57 = vsel %vm2239_vm9, %v2192_v32, %v2965_v47 }
 0xe17   :  { %v2968_v16 = vadd.f32 -1.0, %v3606_v52  ;;  %v2261_v58 = vsel %vm2241_vm10, %v2233_v33, %v2967_v49  ;;  %v2264_v62 = vpack.c.bf16 %v2259_v57, %v2259_v57  ;;  %v3002_v33 = vld [vmem:[%s4552_s12 + $0x11] ss:$0 sm:$0xff] }
 0xe18   :  { %v2260_v59 = vsel %vm2240_vm11, %v2194_v36, %v2966_v56  ;;  %v2266_v1 = vpack.c.bf16 %v2261_v58, %v2261_v58 }
 0xe19   :  { %v2265_v60 = vpack.c.bf16 %v2260_v59, %v2260_v59  ;;  %v2262_v61 = vsel %vm2242_vm12, %v2235_v37, %v2968_v16 }
 0xe1a   :  { %v2267_v63 = vpack.c.bf16 %v2262_v61, %v2262_v61 }
 0xe1b   :  { %2560 = vmatprep.mubr.bf16.mxu0 %v2265_v60 }
 0xe1c   :  { %2600 = vmatprep.mubr.bf16.mxu1 %v2267_v63  ;;  %2561 = vmatmul.mubr.bf16.vlgmr.msra.gmra.mrb[28].mxu0 %v2264_v62 }
 0xe1d   :  { %2601 = vmatmul.mubr.bf16.vlgmr.msra.gmra.mrb[28].mxu1 %v2266_v1  ;;  %3286 = vmatprep.mubr.msk.bf16.mxu0 %vm3610_vm0, %v3609_v0 }
 0xe1e   :  { %3271 = vmatpush3.bf16.msra.mxu0 %v3565_v18 }
 0xe1f   :  { %3272 = vmatprep.subr.bf16.mxu0 %v3609_v0 }
 0xe22   :  { %3273 = vmatpush3.bf16.msra.mxu0 %v3566_v19 }
 0xe23   :  { %3274 = vmatprep.subr.bf16.mxu0 %v3609_v0 }
 0xeef   :  { %v3153_v2 = vpop.f32.mrb[28].mxu0 }
 0xef0   :  { %v3175_v3 = vpop.f32.mrb[28].mxu1  ;;  %v3154_v7 = vpop.f32.mrb[29].mxu0 }
 0xef1   :  { %v3155_v5 = vadd.f32 %v3154_v7, %v3153_v2  ;;  %v3176_v8 = vpop.f32.mrb[29].mxu1  ;;  %v3156_v9 = vpop.f32.mrb[30].mxu0 }
 0xef2   :  { %v3177_v10 = vadd.f32 %v3176_v8, %v3175_v3  ;;  %v3178_v11 = vpop.f32.mrb[30].mxu1  ;;  %v3157_v12 = vpop.f32.mrb[31].mxu0 }
 0xef3   :  { %v2563_v13 = vadd.f32 %v3155_v5, %v2969_v4  ;;  %v3179_v14 = vpop.f32.mrb[31].mxu1 }
 0xef5   :  { %v2603_v15 = vadd.f32 %v3177_v10, %v2563_v13 }
 0xef7   :  { %v2608_v17 = vadd.f32 %v2603_v15, %v4398_v55  ;;  %v3567_v55 = vld [vmem:[%s4562_s11 + $0x10] sm:$0xff]  }
 0xef8   :  { %3275 = vmatpush3.bf16.msra.mxu0 %v3567_v55 }
 0xef9   :  { %2609 = vadd.xlane.f32.xlu0 %v2608_v17  ;;  %3276 = vmatprep.subr.bf16.mxu0 %v3609_v0 }
 0xefc   :  { %3277 = vmatpush3.bf16.msra.mxu0 %v3568_v24 }
 0xefd   :  { %3278 = vmatprep.subr.bf16.mxu0 %v3609_v0 }
 0xf00   :  { %3279 = vmatpush3.bf16.msra.mxu0 %v3569_v25 }
 0xf01   :  { %3280 = vmatprep.subr.bf16.mxu0 %v3609_v0 }
 0xf04   :  { %3281 = vmatpush3.bf16.msra.mxu0 %v3570_v26 }
 0xf05   :  { %3282 = vmatprep.subr.bf16.mxu0 %v3609_v0 }
 0xf08   :  { %3283 = vmatpush3.bf16.msra.mxu0 %v3571_v27 }
 0xf09   :  { %3284 = vmatprep.subr.bf16.mxu0 %v3609_v0  ;;  %v3004_v0 = vld [vmem:[%s4552_s12 + $0x13] ss:$0 sm:$0xff] }
 0xf0c   :  { %3285 = vmatpush3.bf16.msra.mxu0 %v3572_v28 }
 0xf86   :  { %v2610_v20 = vpop.xlane.xlu0 %2609 }
 0xf87   :  { %v2611_v21 = vmul.f32 0.0078125, %v2610_v20 }
 0xf89   :  { %v2612_v22 = vsub.f32 %v2608_v17, %v2611_v21 }
 0xf8b   :  { %v2613_v23 = vmul.f32 %v2612_v22, %v2612_v22 }
 0xf8d   :  { %2614 = vadd.xlane.f32.xlu1 %v2613_v23 }
0x101a   :  { %v2615_v29 = vpop.xlane.xlu1 %2614 }
0x101b   :  { %v2616_v30 = vmul.f32 0.0078125, %v2615_v29 }
0x101d   :  { %v2617_v31 = vadd.f32 1e-05, %v2616_v30 }
0x101f   :  { %3607 = vrsqrt.f32 %v2617_v31 }
0x1029   :  { %v3608_v32 = vpop.eup %3607 }
0x102a   :  { %v2619_v34 = vmul.f32 %v3608_v32, %v2612_v22 }
0x102c   :  { %v2625_v36 = vmul.f32 %v3002_v33, %v2619_v34 }
0x102e   :  { %v2631_v37 = vadd.f32 %v3003_v35, %v2625_v36 }
0x1030   :  { %v2633_v38 = vpack.c.bf16 %v2631_v37, %v2631_v37 }
0x1032   :  { %3287 = vmatmul.mubr.bf16.vlgmr.msra.gmra.mrb[32].mxu0 %v2633_v38 }
0x1105   :  { %v2736_v39 = vpop.f32.mrb[32].mxu0 }
0x1106   :  { %v2737_v40 = vadd.f32 %v3004_v0, %v2736_v39  ;;  %v3288_v41 = vpop.f32.mrb[33].mxu0 }
0x1107   :  { %v2739_v42 = vpop.f32.mrb[34].mxu0 }
0x1108   :  { %2742 = vst [vmem:[%s4563_s14] sm:$0xff] %v2737_v40  ;;  %v3289_v50 = vpop.f32.mrb[35].mxu0 }

</bundles_post_ra>
